<compile_context>
chip_gen: v6e
topology: v6e:2x2x1
jax: 0.10.0
libtpu: 0.0.40
codegen_flags: <defaults>
</compile_context>

<pallas_src>
import functools

import jax
import jax.numpy as jnp
from jax.experimental import pallas as pl
from jax.experimental.pallas import tpu as pltpu

LN_EPS = 1e-5  # PyTorch nn.LayerNorm default


def _cross_attn_kernel(num_heads,
                       e1_ref, e2_ref,
                       k1t_ref, v1t_ref, k2t_ref, v2t_ref,
                       wq_ref, wout_ref,
                       bq_ref, bout_ref, gamma_ref, beta_ref,
                       out1_ref, out2_ref):
    TQ, D = e1_ref.shape[1], e1_ref.shape[2]
    H = num_heads
    hd = D // H
    scale = hd ** (-0.5)
    op_dtype = wq_ref.dtype            # MXU operand dtype (bf16 when inputs are f32)

    wq = wq_ref[...]                                   # (D, D), op_dtype
    bq = bq_ref[...].astype(jnp.float32)               # (1, D)
    bout = bout_ref[...].astype(jnp.float32)
    gamma = gamma_ref[...].astype(jnp.float32)
    beta = beta_ref[...].astype(jnp.float32)

    def one_direction(e_ref, kt_ref, vt_ref, out_ref):
        e_t = e_ref[0]                                 # (TQ, D), input dtype
        # Q projection for this tile only; softmax scale folded into q.
        q = (jnp.dot(e_t.astype(op_dtype), wq,
                     preferred_element_type=jnp.float32) + bq) * scale   # (TQ, D) f32

        acc = jnp.zeros((TQ, D), jnp.float32)          # output-projection accumulator
        for h in range(H):                             # static unroll; H is small
            lo = h * hd
            qh = q[:, lo:lo + hd].astype(op_dtype)     # (TQ, hd)
            kt_h = kt_ref[0, lo:lo + hd, :]            # (hd, N) sublane slice, lane-dense
            vt_h = vt_ref[0, lo:lo + hd, :]            # (hd, N)
            # scores: contract head dim; K already transposed so no k.T needed.
            s = jax.lax.dot_general(qh, kt_h, (((1,), (0,)), ((), ())),
                                    preferred_element_type=jnp.float32)  # (TQ, N)
            s = s - jnp.max(s, axis=-1, keepdims=True)
            p = jnp.exp(s)
            p = p * pl.reciprocal(jnp.sum(p, axis=-1, keepdims=True), approx=True)
            # attention output: contract the sequence axis of p and v^T.
            o_h = jax.lax.dot_general(p.astype(op_dtype), vt_h,
                                      (((1,), (1,)), ((), ())),
                                      preferred_element_type=jnp.float32)  # (TQ, hd)
            # fold the output projection per head: sublane row-slice of Wout,
            # no masked column writes / VMEM round-trip of a (TQ, D) scratch.
            acc = acc + jnp.dot(o_h.astype(op_dtype), wout_ref[lo:lo + hd, :],
                                preferred_element_type=jnp.float32)        # (TQ, D)

        # residual + bias + LayerNorm (element-wise math in f32).
        y = e_t.astype(jnp.float32) + acc + bout
        mu = jnp.mean(y, axis=-1, keepdims=True)
        xc = y - mu
        var = jnp.mean(xc * xc, axis=-1, keepdims=True)   # biased, like torch LN
        out_ref[0] = ((xc * jax.lax.rsqrt(var + LN_EPS)) * gamma
                      + beta).astype(out_ref.dtype)

    one_direction(e1_ref, k2t_ref, v2t_ref, out1_ref)     # e1 attends to e2
    one_direction(e2_ref, k1t_ref, v1t_ref, out2_ref)     # e2 attends to e1


def _pick_q_tile(n):
    """Prefer a multiple-of-8 divisor of n in the 128-256 sweet spot."""
    if n <= 256:
        return n
    for t in range(256, 127, -8):          # lane-dense, low per-step overhead
        if n % t == 0:
            return t
    for t in range(120, 7, -8):
        if n % t == 0:
            return t
    # TODO(synk): ragged last-tile path for N with no multiple-of-8 divisor.
    return n


def _vmem_limit_bytes(N, D, TQ, in_dtype, op_dtype):
    """Working-set estimate (padded to (8, 128) tiles), capped per generation."""
    in_sz = jnp.dtype(in_dtype).itemsize
    op_sz = jnp.dtype(op_dtype).itemsize
    sub = lambda x: -(-x // 8) * 8
    lane = lambda x: -(-x // 128) * 128
    est = 0
    est += 2 * 2 * sub(TQ) * lane(D) * in_sz     # e1/e2 tiles (double-buffered)
    est += 2 * 4 * sub(D) * lane(N) * op_sz      # k/v transposed blocks (double-buffered)
    est += 2 * 2 * sub(D) * lane(D) * op_sz      # wq / wout (double-buffered)
    est += 2 * 4 * 8 * lane(D) * 4               # bias / LN affine rows
    est += 2 * 2 * sub(TQ) * lane(D) * in_sz     # out1/out2 blocks (double-buffered)
    est += 4 * sub(TQ) * lane(N) * 4             # live score / probability tiles (f32)
    est += 6 * sub(TQ) * lane(D) * 4             # q / acc / y temporaries (f32)
    est = int(est * 1.5) + (4 << 20)             # compiler scratch headroom
    try:
        cap = getattr(pltpu.get_tpu_info(), "vmem_capacity_bytes", None) or (128 << 20)
    except Exception:
        cap = 128 << 20
    ceiling = int(cap * 0.75)                    # ~96 MiB on v5e/v6e, ~48 MiB on v7x
    return int(min(max(est, 32 << 20), ceiling))


def cross_attention_layer(e1, e2, params, *, num_heads, q_tile=None, op_dtype=None):
    """params: wqkv (D, 3D) pre-transposed (in, out) with column order [q | k | v],
    bqkv (3D,), wout (D, D) pre-transposed, bout (D,), gamma (D,), beta (D,)."""
    B, N, D = e1.shape
    assert e2.shape == (B, N, D)
    assert D % num_heads == 0

    if op_dtype is None:
        op_dtype = jnp.bfloat16 if e1.dtype == jnp.float32 else e1.dtype
    op_dtype = jnp.dtype(op_dtype)

    if q_tile is None:
        q_tile = _pick_q_tile(N)
    assert N % q_tile == 0 and (q_tile % 8 == 0 or q_tile == N)
    n_q = N // q_tile

    wqkv, bqkv = params["wqkv"], params["bqkv"]
    wq, wk, wv = wqkv[:, :D], wqkv[:, D:2 * D], wqkv[:, 2 * D:]
    bq, bk, bv = bqkv[:D], bqkv[D:2 * D], bqkv[2 * D:]

    # K/V projections hoisted wrapper-side (dense XLA matmul at full MXU
    # efficiency) and stored TRANSPOSED as (B, D, N): per-head access in the
    # kernel is a sublane row slice with the sequence on the dense lane axis.
    def kv_t(e):
        k = e @ wk + bk
        v = e @ wv + bv
        return (jnp.swapaxes(k, 1, 2).astype(op_dtype),
                jnp.swapaxes(v, 1, 2).astype(op_dtype))

    k1t, v1t = kv_t(e1)
    k2t, v2t = kv_t(e2)

    wq_op = wq.astype(op_dtype)
    wout_op = params["wout"].astype(op_dtype)
    bq_f = bq.reshape(1, D).astype(jnp.float32)
    bout_f = params["bout"].reshape(1, D).astype(jnp.float32)
    gamma_f = params["gamma"].reshape(1, D).astype(jnp.float32)
    beta_f = params["beta"].reshape(1, D).astype(jnp.float32)

    emb_spec = pl.BlockSpec((1, q_tile, D), lambda b, q: (b, q, 0))
    kv_spec = pl.BlockSpec((1, D, N), lambda b, q: (b, 0, 0))
    mat_spec = pl.BlockSpec((D, D), lambda b, q: (0, 0))
    vec_spec = pl.BlockSpec((1, D), lambda b, q: (0, 0))
    out_spec = pl.BlockSpec((1, q_tile, D), lambda b, q: (b, q, 0))

    kernel = functools.partial(_cross_attn_kernel, num_heads)

    out1, out2 = pl.pallas_call(
        kernel,
        out_shape=(jax.ShapeDtypeStruct((B, N, D), e1.dtype),
                   jax.ShapeDtypeStruct((B, N, D), e2.dtype)),
        grid_spec=pltpu.PrefetchScalarGridSpec(
            num_scalar_prefetch=0,
            grid=(B, n_q),
            in_specs=[emb_spec, emb_spec,
                      kv_spec, kv_spec, kv_spec, kv_spec,
                      mat_spec, mat_spec,
                      vec_spec, vec_spec, vec_spec, vec_spec],
            out_specs=[out_spec, out_spec]),
        compiler_params=pltpu.CompilerParams(
            # No cross-step scratch carry: every grid point is independent, so
            # both axes are megacore-parallel (work splits across TCs even at B=1).
            dimension_semantics=("parallel", "parallel"),
            vmem_limit_bytes=_vmem_limit_bytes(N, D, q_tile, e1.dtype, op_dtype)),
    )(e1, e2, k1t, v1t, k2t, v2t, wq_op, wout_op, bq_f, bout_f, gamma_f, beta_f)
    return out1, out2


def _reference(e1, e2, params, *, num_heads):
    """Pure-JAX reference mirroring the PyTorch forward, for verification."""
    B, N, D = e1.shape
    hd = D // num_heads
    scale = hd ** (-0.5)
    wqkv, bqkv = params["wqkv"], params["bqkv"]
    wout, bout = params["wout"], params["bout"]
    gamma, beta = params["gamma"], params["beta"]

    def qkv(e):
        x = e @ wqkv + bqkv
        x = x.reshape(B, N, 3, num_heads, hd)
        return x[:, :, 0], x[:, :, 1], x[:, :, 2]

    q1, k1, v1 = qkv(e1)
    q2, k2, v2 = qkv(e2)

    def attend(q, k, v):
        w = jnp.einsum('bnhd,bshd->bhns', q, k) * scale
        w = jax.nn.softmax(w, axis=-1)
        return jnp.einsum('bhns,bshd->bnhd', w, v).reshape(B, N, D)

    def ln(y):
        mu = jnp.mean(y, axis=-1, keepdims=True)
        var = jnp.mean((y - mu) ** 2, axis=-1, keepdims=True)
        return (y - mu) * jax.lax.rsqrt(var + LN_EPS) * gamma + beta

    o1 = ln(e1 + attend(q1, k2, v2) @ wout + bout)
    o2 = ln(e2 + attend(q2, k1, v1) @ wout + bout)
    return o1, o2


if __name__ == "__main__":
    # Small but lane-dense test config: D multiple of 128 keeps vregs/stores
    # full-width; q_tile=8 exercises the query-tile grid axis (grid = (2, 2)).
    B, N, DIM, HEADS = 2, 16, 128, 4

    key = jax.random.PRNGKey(0)
    k_e1, k_e2, k_wqkv, k_bqkv, k_wout, k_bout = jax.random.split(key, 6)

    e1 = jax.random.normal(k_e1, (B, N, DIM), dtype=jnp.float32)
    e2 = jax.random.normal(k_e2, (B, N, DIM), dtype=jnp.float32)

    bound = 1.0 / (DIM ** 0.5)
    params = {
        # stored pre-transposed: (in, out)
        "wqkv": jax.random.uniform(k_wqkv, (DIM, 3 * DIM), jnp.float32, -bound, bound),
        "bqkv": jax.random.uniform(k_bqkv, (3 * DIM,), jnp.float32, -bound, bound),
        "wout": jax.random.uniform(k_wout, (DIM, DIM), jnp.float32, -bound, bound),
        "bout": jax.random.uniform(k_bout, (DIM,), jnp.float32, -bound, bound),
        "gamma": jnp.ones((DIM,), jnp.float32),
        "beta": jnp.zeros((DIM,), jnp.float32),
    }

    ref1, ref2 = _reference(e1, e2, params, num_heads=HEADS)

    # 1) Exact-operand path (f32 MXU operands): tight check of kernel semantics.
    #    Tolerance only covers the approximate (EUP) softmax reciprocal.
    o1f, o2f = cross_attention_layer(e1, e2, params, num_heads=HEADS,
                                     q_tile=8, op_dtype=jnp.float32)
    jax.block_until_ready((o1f, o2f))
    assert jnp.allclose(o1f, ref1, atol=5e-3, rtol=5e-3), \
        float(jnp.max(jnp.abs(o1f - ref1)))
    assert jnp.allclose(o2f, ref2, atol=5e-3, rtol=5e-3), \
        float(jnp.max(jnp.abs(o2f - ref2)))

    # 2) Default fast path (bf16 MXU operands, f32 accumulation): looser
    #    tolerance accounts for bf16 operand rounding vs the all-f32 reference.
    o1b, o2b = cross_attention_layer(e1, e2, params, num_heads=HEADS, q_tile=8)
    jax.block_until_ready((o1b, o2b))
    assert jnp.allclose(o1b, ref1, atol=3e-2, rtol=3e-2), \
        float(jnp.max(jnp.abs(o1b - ref1)))
    assert jnp.allclose(o2b, ref2, atol=3e-2, rtol=3e-2), \
        float(jnp.max(jnp.abs(o2b - ref2)))

    print("KERNEL_OK")
</pallas_src>

<mosaic_0001>
module attributes {stable_mosaic.version = 11 : i64} {
  func.func @_cross_attn_kernel(%arg0: i32, %arg1: i32, %arg2: memref<1x8x128xf32, #tpu.memory_space<vmem>>, %arg3: memref<1x8x128xf32, #tpu.memory_space<vmem>>, %arg4: memref<1x128x16xf32, #tpu.memory_space<vmem>>, %arg5: memref<1x128x16xf32, #tpu.memory_space<vmem>>, %arg6: memref<1x128x16xf32, #tpu.memory_space<vmem>>, %arg7: memref<1x128x16xf32, #tpu.memory_space<vmem>>, %arg8: memref<128x128xf32, #tpu.memory_space<vmem>>, %arg9: memref<128x128xf32, #tpu.memory_space<vmem>>, %arg10: memref<1x128xf32, #tpu.memory_space<vmem>>, %arg11: memref<1x128xf32, #tpu.memory_space<vmem>>, %arg12: memref<1x128xf32, #tpu.memory_space<vmem>>, %arg13: memref<1x128xf32, #tpu.memory_space<vmem>>, %arg14: memref<1x8x128xf32, #tpu.memory_space<vmem>>, %arg15: memref<1x8x128xf32, #tpu.memory_space<vmem>>) attributes {dimension_semantics = [#tpu.dimension_semantics<parallel>, #tpu.dimension_semantics<parallel>], iteration_bounds = array<i64: 2, 2>, scalar_prefetch = 0 : i64, scratch_operands = 0 : i64, tpu.core_type = #tpu.core_type<tc>, window_params = [{transform_indices = @transform_0, window_bounds = array<i64: 1, 8, 128>}, {transform_indices = @transform_1, window_bounds = array<i64: 1, 8, 128>}, {transform_indices = @transform_2, window_bounds = array<i64: 1, 128, 16>}, {transform_indices = @transform_3, window_bounds = array<i64: 1, 128, 16>}, {transform_indices = @transform_4, window_bounds = array<i64: 1, 128, 16>}, {transform_indices = @transform_5, window_bounds = array<i64: 1, 128, 16>}, {pipeline_mode = #tpu.pipeline_mode<synchronous>, transform_indices = @transform_6, window_bounds = array<i64: 128, 128>}, {pipeline_mode = #tpu.pipeline_mode<synchronous>, transform_indices = @transform_7, window_bounds = array<i64: 128, 128>}, {pipeline_mode = #tpu.pipeline_mode<synchronous>, transform_indices = @transform_8, window_bounds = array<i64: 1, 128>}, {pipeline_mode = #tpu.pipeline_mode<synchronous>, transform_indices = @transform_9, window_bounds = array<i64: 1, 128>}, {pipeline_mode = #tpu.pipeline_mode<synchronous>, transform_indices = @transform_10, window_bounds = array<i64: 1, 128>}, {pipeline_mode = #tpu.pipeline_mode<synchronous>, transform_indices = @transform_11, window_bounds = array<i64: 1, 128>}, {transform_indices = @transform_12, window_bounds = array<i64: 1, 8, 128>}, {transform_indices = @transform_13, window_bounds = array<i64: 1, 8, 128>}]} {
    %c0 = arith.constant 0 : index
    %c0_0 = arith.constant 0 : index
    %0 = vector.load %arg8[%c0, %c0_0] : memref<128x128xf32, #tpu.memory_space<vmem>>, vector<128x128xf32>
    %c0_1 = arith.constant 0 : index
    %c0_2 = arith.constant 0 : index
    %1 = vector.load %arg10[%c0_1, %c0_2] : memref<1x128xf32, #tpu.memory_space<vmem>>, vector<1x128xf32>
    %c0_3 = arith.constant 0 : index
    %c0_4 = arith.constant 0 : index
    %2 = vector.load %arg11[%c0_3, %c0_4] : memref<1x128xf32, #tpu.memory_space<vmem>>, vector<1x128xf32>
    %c0_5 = arith.constant 0 : index
    %c0_6 = arith.constant 0 : index
    %3 = vector.load %arg12[%c0_5, %c0_6] : memref<1x128xf32, #tpu.memory_space<vmem>>, vector<1x128xf32>
    %c0_7 = arith.constant 0 : index
    %c0_8 = arith.constant 0 : index
    %4 = vector.load %arg13[%c0_7, %c0_8] : memref<1x128xf32, #tpu.memory_space<vmem>>, vector<1x128xf32>
    %c0_9 = arith.constant 0 : index
    %c0_10 = arith.constant 0 : index
    %c0_11 = arith.constant 0 : index
    %5 = vector.load %arg2[%c0_9, %c0_10, %c0_11] : memref<1x8x128xf32, #tpu.memory_space<vmem>>, vector<1x8x128xf32>
    %6 = vector.shape_cast %5 : vector<1x8x128xf32> to vector<8x128xf32>
    %cst = arith.constant dense<0.000000e+00> : vector<8x128xf32>
    %7 = tpu.matmul %6, %0, %cst {dimension_numbers = #tpu.dot_dimension_numbers<[1], [0], [0], [1], [0, 0, 1, 1], [], []>} : vector<8x128xf32>, vector<128x128xf32>, vector<8x128xf32> -> vector<8x128xf32>
    %8 = vector.broadcast %1 : vector<1x128xf32> to vector<8x128xf32>
    %9 = arith.addf %7, %8 : vector<8x128xf32>
    %cst_12 = arith.constant 0.176776692 : f32
    %10 = vector.broadcast %cst_12 : f32 to vector<8x128xf32>
    %11 = arith.mulf %9, %10 : vector<8x128xf32>
    %cst_13 = arith.constant 0.000000e+00 : f32
    %12 = vector.broadcast %cst_13 : f32 to vector<8x128xf32>
    %13 = vector.extract_strided_slice %11 {offsets = [0, 0], sizes = [8, 32], strides = [1, 1]} : vector<8x128xf32> to vector<8x32xf32>
    %c0_14 = arith.constant 0 : index
    %c0_15 = arith.constant 0 : index
    %c0_16 = arith.constant 0 : index
    %14 = vector.load %arg6[%c0_14, %c0_15, %c0_16] : memref<1x128x16xf32, #tpu.memory_space<vmem>>, vector<1x32x16xf32>
    %15 = vector.shape_cast %14 : vector<1x32x16xf32> to vector<32x16xf32>
    %c0_17 = arith.constant 0 : index
    %c0_18 = arith.constant 0 : index
    %c0_19 = arith.constant 0 : index
    %16 = vector.load %arg7[%c0_17, %c0_18, %c0_19] : memref<1x128x16xf32, #tpu.memory_space<vmem>>, vector<1x32x16xf32>
    %17 = vector.shape_cast %16 : vector<1x32x16xf32> to vector<32x16xf32>
    %cst_20 = arith.constant dense<0.000000e+00> : vector<8x16xf32>
    %18 = tpu.matmul %13, %15, %cst_20 {dimension_numbers = #tpu.dot_dimension_numbers<[1], [0], [0], [1], [0, 0, 1, 1], [], []>} : vector<8x32xf32>, vector<32x16xf32>, vector<8x16xf32> -> vector<8x16xf32>
    %cst_21 = arith.constant dense<0xFF800000> : vector<8xf32>
    %19 = vector.multi_reduction <maximumf>, %18, %cst_21 [1] : vector<8x16xf32> to vector<8xf32>
    %20 = vector.shape_cast %19 : vector<8xf32> to vector<8x1xf32>
    %21 = vector.broadcast %20 : vector<8x1xf32> to vector<8x16xf32>
    %22 = arith.subf %18, %21 : vector<8x16xf32>
    %23 = math.exp %22 : vector<8x16xf32>
    %cst_22 = arith.constant dense<0.000000e+00> : vector<8xf32>
    %24 = vector.multi_reduction <add>, %23, %cst_22 [1] : vector<8x16xf32> to vector<8xf32>
    %25 = vector.shape_cast %24 : vector<8xf32> to vector<8x1xf32>
    %26 = tpu.reciprocal %25 {approx = true} : vector<8x1xf32> -> vector<8x1xf32>
    %27 = vector.broadcast %26 : vector<8x1xf32> to vector<8x16xf32>
    %28 = arith.mulf %23, %27 : vector<8x16xf32>
    %cst_23 = arith.constant dense<0.000000e+00> : vector<8x32xf32>
    %29 = tpu.matmul %28, %17, %cst_23 {dimension_numbers = #tpu.dot_dimension_numbers<[1], [1], [0], [0], [0, 0, 1, 0], [], []>} : vector<8x16xf32>, vector<32x16xf32>, vector<8x32xf32> -> vector<8x32xf32>
    %c0_24 = arith.constant 0 : index
    %c0_25 = arith.constant 0 : index
    %30 = vector.load %arg9[%c0_24, %c0_25] : memref<128x128xf32, #tpu.memory_space<vmem>>, vector<32x128xf32>
    %cst_26 = arith.constant dense<0.000000e+00> : vector<8x128xf32>
    %31 = tpu.matmul %29, %30, %cst_26 {dimension_numbers = #tpu.dot_dimension_numbers<[1], [0], [0], [1], [0, 0, 1, 1], [], []>} : vector<8x32xf32>, vector<32x128xf32>, vector<8x128xf32> -> vector<8x128xf32>
    %32 = arith.addf %12, %31 : vector<8x128xf32>
    %33 = vector.extract_strided_slice %11 {offsets = [0, 32], sizes = [8, 32], strides = [1, 1]} : vector<8x128xf32> to vector<8x32xf32>
    %c0_27 = arith.constant 0 : index
    %c32 = arith.constant 32 : index
    %c0_28 = arith.constant 0 : index
    %34 = vector.load %arg6[%c0_27, %c32, %c0_28] : memref<1x128x16xf32, #tpu.memory_space<vmem>>, vector<1x32x16xf32>
    %35 = vector.shape_cast %34 : vector<1x32x16xf32> to vector<32x16xf32>
    %c0_29 = arith.constant 0 : index
    %c32_30 = arith.constant 32 : index
    %c0_31 = arith.constant 0 : index
    %36 = vector.load %arg7[%c0_29, %c32_30, %c0_31] : memref<1x128x16xf32, #tpu.memory_space<vmem>>, vector<1x32x16xf32>
    %37 = vector.shape_cast %36 : vector<1x32x16xf32> to vector<32x16xf32>
    %cst_32 = arith.constant dense<0.000000e+00> : vector<8x16xf32>
    %38 = tpu.matmul %33, %35, %cst_32 {dimension_numbers = #tpu.dot_dimension_numbers<[1], [0], [0], [1], [0, 0, 1, 1], [], []>} : vector<8x32xf32>, vector<32x16xf32>, vector<8x16xf32> -> vector<8x16xf32>
    %cst_33 = arith.constant dense<0xFF800000> : vector<8xf32>
    %39 = vector.multi_reduction <maximumf>, %38, %cst_33 [1] : vector<8x16xf32> to vector<8xf32>
    %40 = vector.shape_cast %39 : vector<8xf32> to vector<8x1xf32>
    %41 = vector.broadcast %40 : vector<8x1xf32> to vector<8x16xf32>
    %42 = arith.subf %38, %41 : vector<8x16xf32>
    %43 = math.exp %42 : vector<8x16xf32>
    %cst_34 = arith.constant dense<0.000000e+00> : vector<8xf32>
    %44 = vector.multi_reduction <add>, %43, %cst_34 [1] : vector<8x16xf32> to vector<8xf32>
    %45 = vector.shape_cast %44 : vector<8xf32> to vector<8x1xf32>
    %46 = tpu.reciprocal %45 {approx = true} : vector<8x1xf32> -> vector<8x1xf32>
    %47 = vector.broadcast %46 : vector<8x1xf32> to vector<8x16xf32>
    %48 = arith.mulf %43, %47 : vector<8x16xf32>
    %cst_35 = arith.constant dense<0.000000e+00> : vector<8x32xf32>
    %49 = tpu.matmul %48, %37, %cst_35 {dimension_numbers = #tpu.dot_dimension_numbers<[1], [1], [0], [0], [0, 0, 1, 0], [], []>} : vector<8x16xf32>, vector<32x16xf32>, vector<8x32xf32> -> vector<8x32xf32>
    %c32_36 = arith.constant 32 : index
    %c0_37 = arith.constant 0 : index
    %50 = vector.load %arg9[%c32_36, %c0_37] : memref<128x128xf32, #tpu.memory_space<vmem>>, vector<32x128xf32>
    %cst_38 = arith.constant dense<0.000000e+00> : vector<8x128xf32>
    %51 = tpu.matmul %49, %50, %cst_38 {dimension_numbers = #tpu.dot_dimension_numbers<[1], [0], [0], [1], [0, 0, 1, 1], [], []>} : vector<8x32xf32>, vector<32x128xf32>, vector<8x128xf32> -> vector<8x128xf32>
    %52 = arith.addf %32, %51 : vector<8x128xf32>
    %53 = vector.extract_strided_slice %11 {offsets = [0, 64], sizes = [8, 32], strides = [1, 1]} : vector<8x128xf32> to vector<8x32xf32>
    %c0_39 = arith.constant 0 : index
    %c64 = arith.constant 64 : index
    %c0_40 = arith.constant 0 : index
    %54 = vector.load %arg6[%c0_39, %c64, %c0_40] : memref<1x128x16xf32, #tpu.memory_space<vmem>>, vector<1x32x16xf32>
    %55 = vector.shape_cast %54 : vector<1x32x16xf32> to vector<32x16xf32>
    %c0_41 = arith.constant 0 : index
    %c64_42 = arith.constant 64 : index
    %c0_43 = arith.constant 0 : index
    %56 = vector.load %arg7[%c0_41, %c64_42, %c0_43] : memref<1x128x16xf32, #tpu.memory_space<vmem>>, vector<1x32x16xf32>
    %57 = vector.shape_cast %56 : vector<1x32x16xf32> to vector<32x16xf32>
    %cst_44 = arith.constant dense<0.000000e+00> : vector<8x16xf32>
    %58 = tpu.matmul %53, %55, %cst_44 {dimension_numbers = #tpu.dot_dimension_numbers<[1], [0], [0], [1], [0, 0, 1, 1], [], []>} : vector<8x32xf32>, vector<32x16xf32>, vector<8x16xf32> -> vector<8x16xf32>
    %cst_45 = arith.constant dense<0xFF800000> : vector<8xf32>
    %59 = vector.multi_reduction <maximumf>, %58, %cst_45 [1] : vector<8x16xf32> to vector<8xf32>
    %60 = vector.shape_cast %59 : vector<8xf32> to vector<8x1xf32>
    %61 = vector.broadcast %60 : vector<8x1xf32> to vector<8x16xf32>
    %62 = arith.subf %58, %61 : vector<8x16xf32>
    %63 = math.exp %62 : vector<8x16xf32>
    %cst_46 = arith.constant dense<0.000000e+00> : vector<8xf32>
    %64 = vector.multi_reduction <add>, %63, %cst_46 [1] : vector<8x16xf32> to vector<8xf32>
    %65 = vector.shape_cast %64 : vector<8xf32> to vector<8x1xf32>
    %66 = tpu.reciprocal %65 {approx = true} : vector<8x1xf32> -> vector<8x1xf32>
    %67 = vector.broadcast %66 : vector<8x1xf32> to vector<8x16xf32>
    %68 = arith.mulf %63, %67 : vector<8x16xf32>
    %cst_47 = arith.constant dense<0.000000e+00> : vector<8x32xf32>
    %69 = tpu.matmul %68, %57, %cst_47 {dimension_numbers = #tpu.dot_dimension_numbers<[1], [1], [0], [0], [0, 0, 1, 0], [], []>} : vector<8x16xf32>, vector<32x16xf32>, vector<8x32xf32> -> vector<8x32xf32>
    %c64_48 = arith.constant 64 : index
    %c0_49 = arith.constant 0 : index
    %70 = vector.load %arg9[%c64_48, %c0_49] : memref<128x128xf32, #tpu.memory_space<vmem>>, vector<32x128xf32>
    %cst_50 = arith.constant dense<0.000000e+00> : vector<8x128xf32>
    %71 = tpu.matmul %69, %70, %cst_50 {dimension_numbers = #tpu.dot_dimension_numbers<[1], [0], [0], [1], [0, 0, 1, 1], [], []>} : vector<8x32xf32>, vector<32x128xf32>, vector<8x128xf32> -> vector<8x128xf32>
    %72 = arith.addf %52, %71 : vector<8x128xf32>
    %73 = vector.extract_strided_slice %11 {offsets = [0, 96], sizes = [8, 32], strides = [1, 1]} : vector<8x128xf32> to vector<8x32xf32>
    %c0_51 = arith.constant 0 : index
    %c96 = arith.constant 96 : index
    %c0_52 = arith.constant 0 : index
    %74 = vector.load %arg6[%c0_51, %c96, %c0_52] : memref<1x128x16xf32, #tpu.memory_space<vmem>>, vector<1x32x16xf32>
    %75 = vector.shape_cast %74 : vector<1x32x16xf32> to vector<32x16xf32>
    %c0_53 = arith.constant 0 : index
    %c96_54 = arith.constant 96 : index
    %c0_55 = arith.constant 0 : index
    %76 = vector.load %arg7[%c0_53, %c96_54, %c0_55] : memref<1x128x16xf32, #tpu.memory_space<vmem>>, vector<1x32x16xf32>
    %77 = vector.shape_cast %76 : vector<1x32x16xf32> to vector<32x16xf32>
    %cst_56 = arith.constant dense<0.000000e+00> : vector<8x16xf32>
    %78 = tpu.matmul %73, %75, %cst_56 {dimension_numbers = #tpu.dot_dimension_numbers<[1], [0], [0], [1], [0, 0, 1, 1], [], []>} : vector<8x32xf32>, vector<32x16xf32>, vector<8x16xf32> -> vector<8x16xf32>
    %cst_57 = arith.constant dense<0xFF800000> : vector<8xf32>
    %79 = vector.multi_reduction <maximumf>, %78, %cst_57 [1] : vector<8x16xf32> to vector<8xf32>
    %80 = vector.shape_cast %79 : vector<8xf32> to vector<8x1xf32>
    %81 = vector.broadcast %80 : vector<8x1xf32> to vector<8x16xf32>
    %82 = arith.subf %78, %81 : vector<8x16xf32>
    %83 = math.exp %82 : vector<8x16xf32>
    %cst_58 = arith.constant dense<0.000000e+00> : vector<8xf32>
    %84 = vector.multi_reduction <add>, %83, %cst_58 [1] : vector<8x16xf32> to vector<8xf32>
    %85 = vector.shape_cast %84 : vector<8xf32> to vector<8x1xf32>
    %86 = tpu.reciprocal %85 {approx = true} : vector<8x1xf32> -> vector<8x1xf32>
    %87 = vector.broadcast %86 : vector<8x1xf32> to vector<8x16xf32>
    %88 = arith.mulf %83, %87 : vector<8x16xf32>
    %cst_59 = arith.constant dense<0.000000e+00> : vector<8x32xf32>
    %89 = tpu.matmul %88, %77, %cst_59 {dimension_numbers = #tpu.dot_dimension_numbers<[1], [1], [0], [0], [0, 0, 1, 0], [], []>} : vector<8x16xf32>, vector<32x16xf32>, vector<8x32xf32> -> vector<8x32xf32>
    %c96_60 = arith.constant 96 : index
    %c0_61 = arith.constant 0 : index
    %90 = vector.load %arg9[%c96_60, %c0_61] : memref<128x128xf32, #tpu.memory_space<vmem>>, vector<32x128xf32>
    %cst_62 = arith.constant dense<0.000000e+00> : vector<8x128xf32>
    %91 = tpu.matmul %89, %90, %cst_62 {dimension_numbers = #tpu.dot_dimension_numbers<[1], [0], [0], [1], [0, 0, 1, 1], [], []>} : vector<8x32xf32>, vector<32x128xf32>, vector<8x128xf32> -> vector<8x128xf32>
    %92 = arith.addf %72, %91 : vector<8x128xf32>
    %93 = arith.addf %6, %92 : vector<8x128xf32>
    %94 = vector.broadcast %2 : vector<1x128xf32> to vector<8x128xf32>
    %95 = arith.addf %93, %94 : vector<8x128xf32>
    %cst_63 = arith.constant dense<0.000000e+00> : vector<8xf32>
    %96 = vector.multi_reduction <add>, %95, %cst_63 [1] : vector<8x128xf32> to vector<8xf32>
    %97 = vector.shape_cast %96 : vector<8xf32> to vector<8x1xf32>
    %cst_64 = arith.constant 1.280000e+02 : f32
    %98 = vector.broadcast %cst_64 : f32 to vector<8x1xf32>
    %99 = arith.divf %97, %98 : vector<8x1xf32>
    %100 = vector.broadcast %99 : vector<8x1xf32> to vector<8x128xf32>
    %101 = arith.subf %95, %100 : vector<8x128xf32>
    %102 = arith.mulf %101, %101 : vector<8x128xf32>
    %cst_65 = arith.constant dense<0.000000e+00> : vector<8xf32>
    %103 = vector.multi_reduction <add>, %102, %cst_65 [1] : vector<8x128xf32> to vector<8xf32>
    %104 = vector.shape_cast %103 : vector<8xf32> to vector<8x1xf32>
    %cst_66 = arith.constant 1.280000e+02 : f32
    %105 = vector.broadcast %cst_66 : f32 to vector<8x1xf32>
    %106 = arith.divf %104, %105 : vector<8x1xf32>
    %cst_67 = arith.constant 9.99999974E-6 : f32
    %107 = vector.broadcast %cst_67 : f32 to vector<8x1xf32>
    %108 = arith.addf %106, %107 : vector<8x1xf32>
    %109 = math.rsqrt %108 : vector<8x1xf32>
    %110 = vector.broadcast %109 : vector<8x1xf32> to vector<8x128xf32>
    %111 = arith.mulf %101, %110 : vector<8x128xf32>
    %112 = vector.broadcast %3 : vector<1x128xf32> to vector<8x128xf32>
    %113 = arith.mulf %111, %112 : vector<8x128xf32>
    %114 = vector.broadcast %4 : vector<1x128xf32> to vector<8x128xf32>
    %115 = arith.addf %113, %114 : vector<8x128xf32>
    %c0_68 = arith.constant 0 : index
    %c0_69 = arith.constant 0 : index
    %c0_70 = arith.constant 0 : index
    %116 = vector.load %arg14[%c0_68, %c0_69, %c0_70] : memref<1x8x128xf32, #tpu.memory_space<vmem>>, vector<1x8x128xf32>
    %117 = vector.shape_cast %116 : vector<1x8x128xf32> to vector<8x128xf32>
    %118 = vector.shape_cast %115 : vector<8x128xf32> to vector<1x8x128xf32>
    tpu.vector_store %arg14[%c0_68, %c0_69, %c0_70], %118 {strides = array<i32>} : memref<1x8x128xf32, #tpu.memory_space<vmem>>, vector<1x8x128xf32>,
    %c0_71 = arith.constant 0 : index
    %c0_72 = arith.constant 0 : index
    %c0_73 = arith.constant 0 : index
    %119 = vector.load %arg3[%c0_71, %c0_72, %c0_73] : memref<1x8x128xf32, #tpu.memory_space<vmem>>, vector<1x8x128xf32>
    %120 = vector.shape_cast %119 : vector<1x8x128xf32> to vector<8x128xf32>
    %cst_74 = arith.constant dense<0.000000e+00> : vector<8x128xf32>
    %121 = tpu.matmul %120, %0, %cst_74 {dimension_numbers = #tpu.dot_dimension_numbers<[1], [0], [0], [1], [0, 0, 1, 1], [], []>} : vector<8x128xf32>, vector<128x128xf32>, vector<8x128xf32> -> vector<8x128xf32>
    %122 = vector.broadcast %1 : vector<1x128xf32> to vector<8x128xf32>
    %123 = arith.addf %121, %122 : vector<8x128xf32>
    %cst_75 = arith.constant 0.176776692 : f32
    %124 = vector.broadcast %cst_75 : f32 to vector<8x128xf32>
    %125 = arith.mulf %123, %124 : vector<8x128xf32>
    %cst_76 = arith.constant 0.000000e+00 : f32
    %126 = vector.broadcast %cst_76 : f32 to vector<8x128xf32>
    %127 = vector.extract_strided_slice %125 {offsets = [0, 0], sizes = [8, 32], strides = [1, 1]} : vector<8x128xf32> to vector<8x32xf32>
    %c0_77 = arith.constant 0 : index
    %c0_78 = arith.constant 0 : index
    %c0_79 = arith.constant 0 : index
    %128 = vector.load %arg4[%c0_77, %c0_78, %c0_79] : memref<1x128x16xf32, #tpu.memory_space<vmem>>, vector<1x32x16xf32>
    %129 = vector.shape_cast %128 : vector<1x32x16xf32> to vector<32x16xf32>
    %c0_80 = arith.constant 0 : index
    %c0_81 = arith.constant 0 : index
    %c0_82 = arith.constant 0 : index
    %130 = vector.load %arg5[%c0_80, %c0_81, %c0_82] : memref<1x128x16xf32, #tpu.memory_space<vmem>>, vector<1x32x16xf32>
    %131 = vector.shape_cast %130 : vector<1x32x16xf32> to vector<32x16xf32>
    %cst_83 = arith.constant dense<0.000000e+00> : vector<8x16xf32>
    %132 = tpu.matmul %127, %129, %cst_83 {dimension_numbers = #tpu.dot_dimension_numbers<[1], [0], [0], [1], [0, 0, 1, 1], [], []>} : vector<8x32xf32>, vector<32x16xf32>, vector<8x16xf32> -> vector<8x16xf32>
    %cst_84 = arith.constant dense<0xFF800000> : vector<8xf32>
    %133 = vector.multi_reduction <maximumf>, %132, %cst_84 [1] : vector<8x16xf32> to vector<8xf32>
    %134 = vector.shape_cast %133 : vector<8xf32> to vector<8x1xf32>
    %135 = vector.broadcast %134 : vector<8x1xf32> to vector<8x16xf32>
    %136 = arith.subf %132, %135 : vector<8x16xf32>
    %137 = math.exp %136 : vector<8x16xf32>
    %cst_85 = arith.constant dense<0.000000e+00> : vector<8xf32>
    %138 = vector.multi_reduction <add>, %137, %cst_85 [1] : vector<8x16xf32> to vector<8xf32>
    %139 = vector.shape_cast %138 : vector<8xf32> to vector<8x1xf32>
    %140 = tpu.reciprocal %139 {approx = true} : vector<8x1xf32> -> vector<8x1xf32>
    %141 = vector.broadcast %140 : vector<8x1xf32> to vector<8x16xf32>
    %142 = arith.mulf %137, %141 : vector<8x16xf32>
    %cst_86 = arith.constant dense<0.000000e+00> : vector<8x32xf32>
    %143 = tpu.matmul %142, %131, %cst_86 {dimension_numbers = #tpu.dot_dimension_numbers<[1], [1], [0], [0], [0, 0, 1, 0], [], []>} : vector<8x16xf32>, vector<32x16xf32>, vector<8x32xf32> -> vector<8x32xf32>
    %c0_87 = arith.constant 0 : index
    %c0_88 = arith.constant 0 : index
    %144 = vector.load %arg9[%c0_87, %c0_88] : memref<128x128xf32, #tpu.memory_space<vmem>>, vector<32x128xf32>
    %cst_89 = arith.constant dense<0.000000e+00> : vector<8x128xf32>
    %145 = tpu.matmul %143, %144, %cst_89 {dimension_numbers = #tpu.dot_dimension_numbers<[1], [0], [0], [1], [0, 0, 1, 1], [], []>} : vector<8x32xf32>, vector<32x128xf32>, vector<8x128xf32> -> vector<8x128xf32>
    %146 = arith.addf %126, %145 : vector<8x128xf32>
    %147 = vector.extract_strided_slice %125 {offsets = [0, 32], sizes = [8, 32], strides = [1, 1]} : vector<8x128xf32> to vector<8x32xf32>
    %c0_90 = arith.constant 0 : index
    %c32_91 = arith.constant 32 : index
    %c0_92 = arith.constant 0 : index
    %148 = vector.load %arg4[%c0_90, %c32_91, %c0_92] : memref<1x128x16xf32, #tpu.memory_space<vmem>>, vector<1x32x16xf32>
    %149 = vector.shape_cast %148 : vector<1x32x16xf32> to vector<32x16xf32>
    %c0_93 = arith.constant 0 : index
    %c32_94 = arith.constant 32 : index
    %c0_95 = arith.constant 0 : index
    %150 = vector.load %arg5[%c0_93, %c32_94, %c0_95] : memref<1x128x16xf32, #tpu.memory_space<vmem>>, vector<1x32x16xf32>
    %151 = vector.shape_cast %150 : vector<1x32x16xf32> to vector<32x16xf32>
    %cst_96 = arith.constant dense<0.000000e+00> : vector<8x16xf32>
    %152 = tpu.matmul %147, %149, %cst_96 {dimension_numbers = #tpu.dot_dimension_numbers<[1], [0], [0], [1], [0, 0, 1, 1], [], []>} : vector<8x32xf32>, vector<32x16xf32>, vector<8x16xf32> -> vector<8x16xf32>
    %cst_97 = arith.constant dense<0xFF800000> : vector<8xf32>
    %153 = vector.multi_reduction <maximumf>, %152, %cst_97 [1] : vector<8x16xf32> to vector<8xf32>
    %154 = vector.shape_cast %153 : vector<8xf32> to vector<8x1xf32>
    %155 = vector.broadcast %154 : vector<8x1xf32> to vector<8x16xf32>
    %156 = arith.subf %152, %155 : vector<8x16xf32>
    %157 = math.exp %156 : vector<8x16xf32>
    %cst_98 = arith.constant dense<0.000000e+00> : vector<8xf32>
    %158 = vector.multi_reduction <add>, %157, %cst_98 [1] : vector<8x16xf32> to vector<8xf32>
    %159 = vector.shape_cast %158 : vector<8xf32> to vector<8x1xf32>
    %160 = tpu.reciprocal %159 {approx = true} : vector<8x1xf32> -> vector<8x1xf32>
    %161 = vector.broadcast %160 : vector<8x1xf32> to vector<8x16xf32>
    %162 = arith.mulf %157, %161 : vector<8x16xf32>
    %cst_99 = arith.constant dense<0.000000e+00> : vector<8x32xf32>
    %163 = tpu.matmul %162, %151, %cst_99 {dimension_numbers = #tpu.dot_dimension_numbers<[1], [1], [0], [0], [0, 0, 1, 0], [], []>} : vector<8x16xf32>, vector<32x16xf32>, vector<8x32xf32> -> vector<8x32xf32>
    %c32_100 = arith.constant 32 : index
    %c0_101 = arith.constant 0 : index
    %164 = vector.load %arg9[%c32_100, %c0_101] : memref<128x128xf32, #tpu.memory_space<vmem>>, vector<32x128xf32>
    %cst_102 = arith.constant dense<0.000000e+00> : vector<8x128xf32>
    %165 = tpu.matmul %163, %164, %cst_102 {dimension_numbers = #tpu.dot_dimension_numbers<[1], [0], [0], [1], [0, 0, 1, 1], [], []>} : vector<8x32xf32>, vector<32x128xf32>, vector<8x128xf32> -> vector<8x128xf32>
    %166 = arith.addf %146, %165 : vector<8x128xf32>
    %167 = vector.extract_strided_slice %125 {offsets = [0, 64], sizes = [8, 32], strides = [1, 1]} : vector<8x128xf32> to vector<8x32xf32>
    %c0_103 = arith.constant 0 : index
    %c64_104 = arith.constant 64 : index
    %c0_105 = arith.constant 0 : index
    %168 = vector.load %arg4[%c0_103, %c64_104, %c0_105] : memref<1x128x16xf32, #tpu.memory_space<vmem>>, vector<1x32x16xf32>
    %169 = vector.shape_cast %168 : vector<1x32x16xf32> to vector<32x16xf32>
    %c0_106 = arith.constant 0 : index
    %c64_107 = arith.constant 64 : index
    %c0_108 = arith.constant 0 : index
    %170 = vector.load %arg5[%c0_106, %c64_107, %c0_108] : memref<1x128x16xf32, #tpu.memory_space<vmem>>, vector<1x32x16xf32>
    %171 = vector.shape_cast %170 : vector<1x32x16xf32> to vector<32x16xf32>
    %cst_109 = arith.constant dense<0.000000e+00> : vector<8x16xf32>
    %172 = tpu.matmul %167, %169, %cst_109 {dimension_numbers = #tpu.dot_dimension_numbers<[1], [0], [0], [1], [0, 0, 1, 1], [], []>} : vector<8x32xf32>, vector<32x16xf32>, vector<8x16xf32> -> vector<8x16xf32>
    %cst_110 = arith.constant dense<0xFF800000> : vector<8xf32>
    %173 = vector.multi_reduction <maximumf>, %172, %cst_110 [1] : vector<8x16xf32> to vector<8xf32>
    %174 = vector.shape_cast %173 : vector<8xf32> to vector<8x1xf32>
    %175 = vector.broadcast %174 : vector<8x1xf32> to vector<8x16xf32>
    %176 = arith.subf %172, %175 : vector<8x16xf32>
    %177 = math.exp %176 : vector<8x16xf32>
    %cst_111 = arith.constant dense<0.000000e+00> : vector<8xf32>
    %178 = vector.multi_reduction <add>, %177, %cst_111 [1] : vector<8x16xf32> to vector<8xf32>
    %179 = vector.shape_cast %178 : vector<8xf32> to vector<8x1xf32>
    %180 = tpu.reciprocal %179 {approx = true} : vector<8x1xf32> -> vector<8x1xf32>
    %181 = vector.broadcast %180 : vector<8x1xf32> to vector<8x16xf32>
    %182 = arith.mulf %177, %181 : vector<8x16xf32>
    %cst_112 = arith.constant dense<0.000000e+00> : vector<8x32xf32>
    %183 = tpu.matmul %182, %171, %cst_112 {dimension_numbers = #tpu.dot_dimension_numbers<[1], [1], [0], [0], [0, 0, 1, 0], [], []>} : vector<8x16xf32>, vector<32x16xf32>, vector<8x32xf32> -> vector<8x32xf32>
    %c64_113 = arith.constant 64 : index
    %c0_114 = arith.constant 0 : index
    %184 = vector.load %arg9[%c64_113, %c0_114] : memref<128x128xf32, #tpu.memory_space<vmem>>, vector<32x128xf32>
    %cst_115 = arith.constant dense<0.000000e+00> : vector<8x128xf32>
    %185 = tpu.matmul %183, %184, %cst_115 {dimension_numbers = #tpu.dot_dimension_numbers<[1], [0], [0], [1], [0, 0, 1, 1], [], []>} : vector<8x32xf32>, vector<32x128xf32>, vector<8x128xf32> -> vector<8x128xf32>
    %186 = arith.addf %166, %185 : vector<8x128xf32>
    %187 = vector.extract_strided_slice %125 {offsets = [0, 96], sizes = [8, 32], strides = [1, 1]} : vector<8x128xf32> to vector<8x32xf32>
    %c0_116 = arith.constant 0 : index
    %c96_117 = arith.constant 96 : index
    %c0_118 = arith.constant 0 : index
    %188 = vector.load %arg4[%c0_116, %c96_117, %c0_118] : memref<1x128x16xf32, #tpu.memory_space<vmem>>, vector<1x32x16xf32>
    %189 = vector.shape_cast %188 : vector<1x32x16xf32> to vector<32x16xf32>
    %c0_119 = arith.constant 0 : index
    %c96_120 = arith.constant 96 : index
    %c0_121 = arith.constant 0 : index
    %190 = vector.load %arg5[%c0_119, %c96_120, %c0_121] : memref<1x128x16xf32, #tpu.memory_space<vmem>>, vector<1x32x16xf32>
    %191 = vector.shape_cast %190 : vector<1x32x16xf32> to vector<32x16xf32>
    %cst_122 = arith.constant dense<0.000000e+00> : vector<8x16xf32>
    %192 = tpu.matmul %187, %189, %cst_122 {dimension_numbers = #tpu.dot_dimension_numbers<[1], [0], [0], [1], [0, 0, 1, 1], [], []>} : vector<8x32xf32>, vector<32x16xf32>, vector<8x16xf32> -> vector<8x16xf32>
    %cst_123 = arith.constant dense<0xFF800000> : vector<8xf32>
    %193 = vector.multi_reduction <maximumf>, %192, %cst_123 [1] : vector<8x16xf32> to vector<8xf32>
    %194 = vector.shape_cast %193 : vector<8xf32> to vector<8x1xf32>
    %195 = vector.broadcast %194 : vector<8x1xf32> to vector<8x16xf32>
    %196 = arith.subf %192, %195 : vector<8x16xf32>
    %197 = math.exp %196 : vector<8x16xf32>
    %cst_124 = arith.constant dense<0.000000e+00> : vector<8xf32>
    %198 = vector.multi_reduction <add>, %197, %cst_124 [1] : vector<8x16xf32> to vector<8xf32>
    %199 = vector.shape_cast %198 : vector<8xf32> to vector<8x1xf32>
    %200 = tpu.reciprocal %199 {approx = true} : vector<8x1xf32> -> vector<8x1xf32>
    %201 = vector.broadcast %200 : vector<8x1xf32> to vector<8x16xf32>
    %202 = arith.mulf %197, %201 : vector<8x16xf32>
    %cst_125 = arith.constant dense<0.000000e+00> : vector<8x32xf32>
    %203 = tpu.matmul %202, %191, %cst_125 {dimension_numbers = #tpu.dot_dimension_numbers<[1], [1], [0], [0], [0, 0, 1, 0], [], []>} : vector<8x16xf32>, vector<32x16xf32>, vector<8x32xf32> -> vector<8x32xf32>
    %c96_126 = arith.constant 96 : index
    %c0_127 = arith.constant 0 : index
    %204 = vector.load %arg9[%c96_126, %c0_127] : memref<128x128xf32, #tpu.memory_space<vmem>>, vector<32x128xf32>
    %cst_128 = arith.constant dense<0.000000e+00> : vector<8x128xf32>
    %205 = tpu.matmul %203, %204, %cst_128 {dimension_numbers = #tpu.dot_dimension_numbers<[1], [0], [0], [1], [0, 0, 1, 1], [], []>} : vector<8x32xf32>, vector<32x128xf32>, vector<8x128xf32> -> vector<8x128xf32>
    %206 = arith.addf %186, %205 : vector<8x128xf32>
    %207 = arith.addf %120, %206 : vector<8x128xf32>
    %208 = vector.broadcast %2 : vector<1x128xf32> to vector<8x128xf32>
    %209 = arith.addf %207, %208 : vector<8x128xf32>
    %cst_129 = arith.constant dense<0.000000e+00> : vector<8xf32>
    %210 = vector.multi_reduction <add>, %209, %cst_129 [1] : vector<8x128xf32> to vector<8xf32>
    %211 = vector.shape_cast %210 : vector<8xf32> to vector<8x1xf32>
    %cst_130 = arith.constant 1.280000e+02 : f32
    %212 = vector.broadcast %cst_130 : f32 to vector<8x1xf32>
    %213 = arith.divf %211, %212 : vector<8x1xf32>
    %214 = vector.broadcast %213 : vector<8x1xf32> to vector<8x128xf32>
    %215 = arith.subf %209, %214 : vector<8x128xf32>
    %216 = arith.mulf %215, %215 : vector<8x128xf32>
    %cst_131 = arith.constant dense<0.000000e+00> : vector<8xf32>
    %217 = vector.multi_reduction <add>, %216, %cst_131 [1] : vector<8x128xf32> to vector<8xf32>
    %218 = vector.shape_cast %217 : vector<8xf32> to vector<8x1xf32>
    %cst_132 = arith.constant 1.280000e+02 : f32
    %219 = vector.broadcast %cst_132 : f32 to vector<8x1xf32>
    %220 = arith.divf %218, %219 : vector<8x1xf32>
    %cst_133 = arith.constant 9.99999974E-6 : f32
    %221 = vector.broadcast %cst_133 : f32 to vector<8x1xf32>
    %222 = arith.addf %220, %221 : vector<8x1xf32>
    %223 = math.rsqrt %222 : vector<8x1xf32>
    %224 = vector.broadcast %223 : vector<8x1xf32> to vector<8x128xf32>
    %225 = arith.mulf %215, %224 : vector<8x128xf32>
    %226 = vector.broadcast %3 : vector<1x128xf32> to vector<8x128xf32>
    %227 = arith.mulf %225, %226 : vector<8x128xf32>
    %228 = vector.broadcast %4 : vector<1x128xf32> to vector<8x128xf32>
    %229 = arith.addf %227, %228 : vector<8x128xf32>
    %c0_134 = arith.constant 0 : index
    %c0_135 = arith.constant 0 : index
    %c0_136 = arith.constant 0 : index
    %230 = vector.load %arg15[%c0_134, %c0_135, %c0_136] : memref<1x8x128xf32, #tpu.memory_space<vmem>>, vector<1x8x128xf32>
    %231 = vector.shape_cast %230 : vector<1x8x128xf32> to vector<8x128xf32>
    %232 = vector.shape_cast %229 : vector<8x128xf32> to vector<1x8x128xf32>
    tpu.vector_store %arg15[%c0_134, %c0_135, %c0_136], %232 {strides = array<i32>} : memref<1x8x128xf32, #tpu.memory_space<vmem>>, vector<1x8x128xf32>,
    return
  }
  func.func @transform_0(%arg0: i32, %arg1: i32) -> (i32, i32, i32) {
    %c0_i32 = arith.constant 0 : i32
    %c0_i32_0 = arith.constant 0 : i32
    return %arg0, %arg1, %c0_i32 : i32, i32, i32
  }
  func.func @transform_1(%arg0: i32, %arg1: i32) -> (i32, i32, i32) {
    %c0_i32 = arith.constant 0 : i32
    %c0_i32_0 = arith.constant 0 : i32
    return %arg0, %arg1, %c0_i32 : i32, i32, i32
  }
  func.func @transform_2(%arg0: i32, %arg1: i32) -> (i32, i32, i32) {
    %c0_i32 = arith.constant 0 : i32
    %c0_i32_0 = arith.constant 0 : i32
    %c0_i32_1 = arith.constant 0 : i32
    return %arg0, %c0_i32, %c0_i32_0 : i32, i32, i32
  }
  func.func @transform_3(%arg0: i32, %arg1: i32) -> (i32, i32, i32) {
    %c0_i32 = arith.constant 0 : i32
    %c0_i32_0 = arith.constant 0 : i32
    %c0_i32_1 = arith.constant 0 : i32
    return %arg0, %c0_i32, %c0_i32_0 : i32, i32, i32
  }
  func.func @transform_4(%arg0: i32, %arg1: i32) -> (i32, i32, i32) {
    %c0_i32 = arith.constant 0 : i32
    %c0_i32_0 = arith.constant 0 : i32
    %c0_i32_1 = arith.constant 0 : i32
    return %arg0, %c0_i32, %c0_i32_0 : i32, i32, i32
  }
  func.func @transform_5(%arg0: i32, %arg1: i32) -> (i32, i32, i32) {
    %c0_i32 = arith.constant 0 : i32
    %c0_i32_0 = arith.constant 0 : i32
    %c0_i32_1 = arith.constant 0 : i32
    return %arg0, %c0_i32, %c0_i32_0 : i32, i32, i32
  }
  func.func @transform_6(%arg0: i32, %arg1: i32) -> (i32, i32) {
    %c0_i32 = arith.constant 0 : i32
    %c0_i32_0 = arith.constant 0 : i32
    %c0_i32_1 = arith.constant 0 : i32
    return %c0_i32, %c0_i32_0 : i32, i32
  }
  func.func @transform_7(%arg0: i32, %arg1: i32) -> (i32, i32) {
    %c0_i32 = arith.constant 0 : i32
    %c0_i32_0 = arith.constant 0 : i32
    %c0_i32_1 = arith.constant 0 : i32
    return %c0_i32, %c0_i32_0 : i32, i32
  }
  func.func @transform_8(%arg0: i32, %arg1: i32) -> (i32, i32) {
    %c0_i32 = arith.constant 0 : i32
    %c0_i32_0 = arith.constant 0 : i32
    %c0_i32_1 = arith.constant 0 : i32
    return %c0_i32, %c0_i32_0 : i32, i32
  }
  func.func @transform_9(%arg0: i32, %arg1: i32) -> (i32, i32) {
    %c0_i32 = arith.constant 0 : i32
    %c0_i32_0 = arith.constant 0 : i32
    %c0_i32_1 = arith.constant 0 : i32
    return %c0_i32, %c0_i32_0 : i32, i32
  }
  func.func @transform_10(%arg0: i32, %arg1: i32) -> (i32, i32) {
    %c0_i32 = arith.constant 0 : i32
    %c0_i32_0 = arith.constant 0 : i32
    %c0_i32_1 = arith.constant 0 : i32
    return %c0_i32, %c0_i32_0 : i32, i32
  }
  func.func @transform_11(%arg0: i32, %arg1: i32) -> (i32, i32) {
    %c0_i32 = arith.constant 0 : i32
    %c0_i32_0 = arith.constant 0 : i32
    %c0_i32_1 = arith.constant 0 : i32
    return %c0_i32, %c0_i32_0 : i32, i32
  }
  func.func @transform_12(%arg0: i32, %arg1: i32) -> (i32, i32, i32) {
    %c0_i32 = arith.constant 0 : i32
    %c0_i32_0 = arith.constant 0 : i32
    return %arg0, %arg1, %c0_i32 : i32, i32, i32
  }
  func.func @transform_13(%arg0: i32, %arg1: i32) -> (i32, i32, i32) {
    %c0_i32 = arith.constant 0 : i32
    %c0_i32_0 = arith.constant 0 : i32
    return %arg0, %arg1, %c0_i32 : i32, i32, i32
  }
}

</mosaic_0001>

<bundles_post_ra>
// kernel: tpu_custom_call.1
= control target key start
LH: loop header
LB: loop body
LE: loop exit
PB: predicated region body
PF: predicated region fallthrough
CT: control target
= control target key end

     0   :  { %s4753_s0 = inlined_call_operand.vmem [shape: f32[2,16,128], index: 0, kind: input, shape index: {}]   ;;  %s4754_s1 = inlined_call_operand.vmem [shape: f32[2,16,128], index: 1, kind: input, shape index: {}]   ;;  %s4755_s2 = inlined_call_operand.vmem [shape: f32[2,128,16], index: 2, kind: input, shape index: {}]   ;;  %s4756_s3 = inlined_call_operand.vmem [shape: f32[2,128,16], index: 3, kind: input, shape index: {}]   ;;  %s4757_s4 = inlined_call_operand.vmem [shape: f32[2,128,16], index: 4, kind: input, shape index: {}]   ;;  %s4758_s5 = inlined_call_operand.vmem [shape: f32[2,128,16], index: 5, kind: input, shape index: {}]   ;;  %s4759_s6 = inlined_call_operand.vmem [shape: f32[128,128], index: 6, kind: input, shape index: {}]   ;;  %s4760_s7 = inlined_call_operand.vmem [shape: f32[128,128], index: 7, kind: input, shape index: {}]   ;;  %s4761_s8 = inlined_call_operand.vmem [shape: f32[1,128], index: 8, kind: input, shape index: {}]   ;;  %s4762_s9 = inlined_call_operand.vmem [shape: f32[1,128], index: 9, kind: input, shape index: {}]   ;;  %s4763_s10 = inlined_call_operand.vmem [shape: f32[1,128], index: 10, kind: input, shape index: {}]   ;;  %s4764_s11 = inlined_call_operand.vmem [shape: f32[1,128], index: 11, kind: input, shape index: {}]   ;;  %s4765_s12 = inlined_call_operand.hbm [shape: f32[2,16,128], index: 12, kind: output, shape index: {0}]   ;;  %s4766_s13 = inlined_call_operand.hbm [shape: f32[2,16,128], index: 13, kind: output, shape index: {1}]  }
   0x1   :  { %4777 = sst [smem:[#allocation14_spill]] %s4753_s0 }
   0x2   :  { %4778 = sst [smem:[#allocation15_spill]] %s4754_s1 }
   0x3   :  { %4779 = sst [smem:[#allocation16_spill]] %s4757_s4 }
   0x4   :  { %19 = vsyncpa [#allocation3], 0 }
   0x5   :  { %21 = vsyncpa [#allocation3 + $0x1], 0 }
   0x6   :  { %22 = vsyncpa [#allocation5], 0 }
   0x7   :  { %24 = vsyncpa [#allocation5 + $0x1], 0  ;;  %s3964_s25 = smov 0   ;;  %s3966_s26 = smov 0  }
   0x8   :  { %s3968_s27 = smov 0   ;;  %s3970_s28 = smov 0  }
   0x9   :  { %s3972_s29 = smov 0   ;;  %s3974_s30 = smov 0  }
   0xa   :  { %s3976_s14 = smov 0   ;;  %s3978_s15 = smov 0  }
   0xb LB: > { %4780 = sst [smem:[#allocation8_spill]] %s3857_s25  ;;  %s3067_s16 = sadd.s32 4294967295, %s3885_s15   ;;  %s3885_s15 = sphi %s3978_s15, %s30_s15   ;;  %s3881_s14 = sphi %s3976_s14, %s4801_s14   ;;  %s3877_s30 = sphi %s3974_s30, %s4800_s30   ;;  %s3873_s29 = sphi %s3972_s29, %s4799_s29   ;;  %s3869_s28 = sphi %s3970_s28, %s4798_s28   ;;  %s3865_s27 = sphi %s3968_s27, %s4804_s27   ;;  %s3861_s26 = sphi %s3966_s26, %s4803_s26   ;;  %s3857_s25 = sphi %s3964_s25, %s4802_s25  }
   0xc   : > { %4781 = sst [smem:[#allocation9_spill]] %s3877_s30  ;;  %s3068_s17 = sadd.s32 4294967294, %s3885_s15  }
   0xd   : > { %4782 = sst [smem:[#allocation10_spill]] %s3881_s14  ;;  %s39_s18 = sadd.s32 1, %s3877_s30 }
   0xe   : > { %p40_p0 = scmp.ge.s32.totalorder %s39_s18, 2  ;;  %s42_s19 = sadd.s32 1, %s3881_s14 }
   0xf   : > { %p347_p1 = scmp.ne.s32.totalorder %s3865_s27, %s3861_s26  ;;  %p348_p2 = scmp.eq.s32.totalorder %s3067_s16, 3 }
  0x10   : > { %s4806_s18 = smov (%p40_p0, %s39_s18), 0  ;;  %s4808_s19 = smov (!%p40_p0, %s42_s19), %s3881_s14 }
  0x11   : > { %4783 = sst [smem:[#allocation11_spill]] %s4806_s18  ;;  %s333_s20 = ssub.s32 %s3877_s30, %s4806_s18 }
  0x12   : > { %p4015_p3 = por %p348_p2, %p347_p1  ;;  %p44_p4 = scmp.ge.s32.totalorder %s4808_s19, 2 }
  0x13   : > { %p353_p5 = scmp.ne.s32.totalorder %s3861_s26, %s3857_s25  ;;  %p354_p6 = scmp.eq.s32.totalorder %s3068_s17, 3 }
  0x14   : > { %p3071_p7 = scmp.ge.s32.totalorder %s3885_s15, 1  ;;  %s4810_s19 = smov (%p44_p4, %s4808_s19), 0 }
  0x15   : > { %4785 = sst [smem:[#allocation12_spill]] %s4810_s19  ;;  %p4024_p8 = por %p354_p6, %p353_p5 }
  0x16   : > { %p472_p9 = scmp.lt.s32.totalorder %s3885_s15, 5  ;;  %s332_s23 = ssub.s32 %s3881_s14, %s4810_s19 }
  0x17   : > { %s337_s24 = sadd.s32 1, %s3865_s27  ;;  %s334_s16 = sor.u32 %s333_s20, %s332_s23 }
  0x18   : > { %p473_p10 = pnand %p3071_p7, %p472_p9  ;;  %p335_p11 = scmp.eq.s32.totalorder %s334_s16, 0 }
  0x19   : > { %p552_p12 = scmp.lt.s32.totalorder (!%p473_p10), %s3873_s29, 1  ;;  %s4788_s4 = sld [smem:[#allocation16_spill]] (!%p473_p10) }
  0x1a   : > { %s4033_s18 = scalar_select %p335_p11, %s3865_s27, %s337_s24  }
  0x1b   : > { %476 = sbr.rel (%p473_p10) target bundleno = 5869 (0x16ed), region = 68  ;;  %p554_p13 = scmp.lt.s32.totalorder (!%p473_p10), %s3869_s28, 1 }
  0x1c   : > { %4787 = sst [smem:[#allocation13_spill]] %s4033_s18  ;;  %s4773_s24 = smov (!%p473_p10), 96  }
  0x1d   : > { %s4789_s0 = sld [smem:[#allocation14_spill]] (!%p473_p10)  ;;  %s4772_s23 = smov (!%p473_p10), 64  }
  0x1e   : > { %s4790_s1 = sld [smem:[#allocation15_spill]] (!%p473_p10) }
  0x20   : > { %v4038_v0 = vld [vmem:[%s4759_s6 + $0x78] sm:$0xff]  ;;  %v3887_v1 = vmov 0.0   ;;  %v4045_v2 = vld [vmem:[%s4759_s6 + $0x70] sm:$0xff]  ;;  %vm3888_vm0 = vmmov 0   ;;  %s4051_s25 = scalar_select %p552_p12, %s3873_s29, 1  ;;  %v4058_v3 = vld [vmem:[%s4759_s6 + $0x68] sm:$0xff] }
  0x21   : > { %3312 = vmatprep.subr.mxu0 %v3887_v1  ;;  %3344 = vmatprep.mubr.msk.f32.mxu0 %vm3888_vm0, %v3887_v1  ;;  %v4070_v4 = vld [vmem:[%s4759_s6 + $0x60] sm:$0xff]  ;;  %v4077_v5 = vld [vmem:[%s4759_s6 + $0x58] sm:$0xff]  ;;  %v4091_v7 = vld [vmem:[%s4759_s6 + $0x50] sm:$0xff]  ;;  %s555_s30 = scalar_select %p554_p13, %s3869_s28, 1  ;;  %vm694_vm1 = vcmask 261120   ;;  %vm768_vm2 = vcmask 130048  }
  0x22   : > { %3313 = vmatpush3.msra.mxu0 %v4038_v0  ;;  %3347 = vmatprep.subr.mxu1 %v3887_v1  ;;  %s4064_s19 = sshll.u32 %s4051_s25, 7  ;;  %v4099_v8 = vld [vmem:[%s4759_s6 + $0x48] sm:$0xff]  ;;  %v4106_v9 = vld [vmem:[%s4759_s6 + $0x40] sm:$0xff]  ;;  %v4114_v10 = vld [vmem:[%s4759_s6 + $0x38] sm:$0xff]  ;;  %s3074_s20 = sshll.u32 %s4051_s25, 1 }
  0x23   : > { %3314 = vmatprep.subr.mxu0 %v3887_v1  ;;  %3355 = vmatprep.mubr.msk.f32.mxu1 %vm3888_vm0, %v3887_v1  ;;  %s4083_s14 = scalar_lea.vmem %s4788_s4, %s4064_s19  ;;  %v4121_v11 = vld [vmem:[%s4759_s6 + $0x30] sm:$0xff]  ;;  %v4130_v12 = vld [vmem:[%s4759_s6 + $0x28] sm:$0xff]  ;;  %v4137_v13 = vld [vmem:[%s4759_s6 + $0x20] sm:$0xff]  ;;  %s4139_s16 = sadd.s32 %s3074_s20, %s555_s30 }
  0x24   : > { %3315 = vmatpush3.msra.mxu0 %v4045_v2  ;;  %v689_v6 = vld [vmem:[%s4083_s14 + $0x18] sm:$0xff]  ;;  %s3075_s25 = sshll.u32 %s4139_s16, 3  ;;  %v4154_v15 = vld [vmem:[%s4759_s6 + $0x10] sm:$0xff]  ;;  %v4161_v16 = vld [vmem:[%s4759_s6 + $0x8] sm:$0xff]  ;;  %s4210_s17 = scalar_lea.vmem %s4758_s5, %s4064_s19 }
  0x25   : > { %3316 = vmatprep.subr.mxu0 %v3887_v1  ;;  %3348 = vmatpush3.msra.mxu1 %v689_v6  ;;  %v4146_v14 = vld [vmem:[%s4759_s6 + $0x18] sm:$0xff]  ;;  %s559_s18 = scalar_lea.vmem %s4789_s0, %s3075_s25  ;;  %v4173_v17 = vld [vmem:[%s4759_s6] sm:$0xff]  ;;  %v688_v19 = vld [vmem:[%s4083_s14 + $0x10] sm:$0xff]  ;;  %s4774_s4 = smov 32  }
  0x26   : > { %3317 = vmatpush3.msra.mxu0 %v4058_v3  ;;  %3349 = vmatprep.subr.mxu1 %v3887_v1  ;;  %v4176_v18 = vld [vmem:[%s559_s18] sm:$0xff]  ;;  %v687_v20 = vld [vmem:[%s4083_s14 + $0x8] sm:$0xff]  ;;  %v693_v35 = vld [vmem:[%s4210_s17 + $0x18] sm:$0xff]  ;;  %s567_s20 = scalar_lea.vmem %s4790_s1, %s3075_s25  ;;  %s4516_s18 = scalar_lea.vmem %s4756_s3, %s4064_s19 }
  0x27   : > { %3318 = vmatprep.subr.mxu0 %v3887_v1  ;;  %3350 = vmatpush3.msra.mxu1 %v688_v19  ;;  %v686_v21 = vld [vmem:[%s4083_s14] sm:$0xff]  ;;  %v692_v36 = vld [vmem:[%s4210_s17 + $0x10] sm:$0xff]  ;;  %v691_v37 = vld [vmem:[%s4210_s17 + $0x8] sm:$0xff]  ;;  %s4792_s30 = smov 64   ;;  %s4671_s16 = sand.u32 1, %s3861_s26  }
  0x28   : > { %3319 = vmatpush3.msra.mxu0 %v4070_v4  ;;  %3351 = vmatprep.subr.mxu1 %v3887_v1  ;;  %v4193_v22 = vld [vmem:[%s4761_s8] ss:$0 sm:$0xff]  ;;  %v872_v42 = vld [vmem:[%s4083_s14 + $0x38] sm:$0xff]  ;;  %v871_v43 = vld [vmem:[%s4083_s14 + $0x30] sm:$0xff]  ;;  %s4775_s25 = sshll.u32 %s4671_s16, 3 }
  0x29   : > { %3320 = vmatprep.subr.mxu0 %v3887_v1  ;;  %3352 = vmatpush3.msra.mxu1 %v687_v20  ;;  %v690_v38 = vld [vmem:[%s4210_s17] sm:$0xff]  ;;  %v870_v44 = vld [vmem:[%s4083_s14 + $0x28] sm:$0xff]  ;;  %v876_v57 = vld [vmem:[%s4210_s17 + $0x38] sm:$0xff] }
  0x2a   : > { %3321 = vmatpush3.msra.mxu0 %v4077_v5  ;;  %3353 = vmatprep.subr.mxu1 %v3887_v1  ;;  %v869_v45 = vld [vmem:[%s4083_s14 + $0x20] sm:$0xff]  ;;  %v875_v58 = vld [vmem:[%s4210_s17 + $0x30] sm:$0xff]  ;;  %v874_v59 = vld [vmem:[%s4210_s17 + $0x28] sm:$0xff] }
  0x2b   : > { %3322 = vmatprep.subr.mxu0 %v3887_v1  ;;  %3354 = vmatpush3.msra.mxu1 %v686_v21  ;;  %v873_v60 = vld [vmem:[%s4210_s17 + $0x20] sm:$0xff]  ;;  %v4259_v61 = vld [vmem:[%s4760_s7 + $0x38] sm:$0xff]  ;;  %v4264_v62 = vld [vmem:[%s4760_s7 + $0x30] sm:$0xff] }
  0x2c   : > { %3323 = vmatpush3.msra.mxu0 %v4091_v7  ;;  %3358 = vmatprep.subr.mxu1 %v3887_v1  ;;  %v4271_v63 = vld [vmem:[%s4760_s7 + $0x28] sm:$0xff]  ;;  %v4278_v6 = vld [vmem:[%s4760_s7 + $0x20] sm:$0xff] }
  0x2d   : > { %3324 = vmatprep.subr.mxu0 %v3887_v1 }
  0x2e   : > { %3325 = vmatpush3.msra.mxu0 %v4099_v8 }
  0x2f   : > { %3326 = vmatprep.subr.mxu0 %v3887_v1 }
  0x30   : > { %3327 = vmatpush3.msra.mxu0 %v4106_v9 }
  0x31   : > { %3328 = vmatprep.subr.mxu0 %v3887_v1 }
  0x32   : > { %3329 = vmatpush3.msra.mxu0 %v4114_v10 }
  0x33   : > { %3330 = vmatprep.subr.mxu0 %v3887_v1 }
  0x34   : > { %3331 = vmatpush3.msra.mxu0 %v4121_v11 }
  0x35   : > { %3332 = vmatprep.subr.mxu0 %v3887_v1 }
  0x36   : > { %3333 = vmatpush3.msra.mxu0 %v4130_v12 }
  0x37   : > { %3334 = vmatprep.subr.mxu0 %v3887_v1 }
  0x38   : > { %3335 = vmatpush3.msra.mxu0 %v4137_v13 }
  0x39   : > { %3336 = vmatprep.subr.mxu0 %v3887_v1 }
  0x3a   : > { %3337 = vmatpush3.msra.mxu0 %v4146_v14 }
  0x3b   : > { %3338 = vmatprep.subr.mxu0 %v3887_v1 }
  0x3c   : > { %3339 = vmatpush3.msra.mxu0 %v4154_v15 }
  0x3d   : > { %3340 = vmatprep.subr.mxu0 %v3887_v1 }
  0x3e   : > { %3341 = vmatpush3.msra.mxu0 %v4161_v16 }
  0x3f   : > { %3342 = vmatprep.subr.mxu0 %v3887_v1 }
  0x40   : > { %3343 = vmatpush3.msra.mxu0 %v4173_v17 }
  0x41   : > { %3345 = vmatmul.mubr.f32.vlgmr.msra.gmra.mxu0 %v4176_v18  ;;  %3380 = vmatprep.subr.mxu0 %v3887_v1 }
  0x42   : > { %3388 = vmatprep.mubr.msk.f32.mxu0 %vm3888_vm0, %v3887_v1  ;;  %3381 = vmatpush3.xpose.msk.msra.mxu0 %vm768_vm2, %v876_v57 }
  0x43   : > { %3382 = vmatprep.subr.mxu0 %v3887_v1 }
  0x46   : > { %3383 = vmatpush3.xpose.msk.msra.mxu0 %vm768_vm2, %v875_v58  ;;  %v1456_v58 = vld [vmem:[%s4083_s14 + $0x78] sm:$0xff] }
  0x47   : > { %3384 = vmatprep.subr.mxu0 %v3887_v1 }
  0x4a   : > { %3385 = vmatpush3.xpose.msk.msra.mxu0 %vm768_vm2, %v874_v59 }
  0x4b   : > { %3386 = vmatprep.subr.mxu0 %v3887_v1 }
  0x4e   : > { %3387 = vmatpush3.xpose.msk.msra.mxu0 %vm768_vm2, %v873_v60  ;;  %v1455_v60 = vld [vmem:[%s4083_s14 + $0x70] sm:$0xff] }
  0x4f   : > { %3413 = vmatprep.subr.mxu0 %v3887_v1 }
 0x101   : > { %v681_v23 = vpop.f32.mrf.mxu0 }
 0x102   : > { %v682_v24 = vadd.f32 %v4193_v22, %v681_v23  ;;  %v1200_v23 = vld [vmem:[%s4083_s14 + $0x58] sm:$0xff] }
 0x103   : > { %v3346_v25 = vpop.f32.mrf.mxu0 }
 0x104   : > { %v4196_v26 = vmul.f32 0.17677669, %v682_v24  ;;  %v1199_v24 = vld [vmem:[%s4083_s14 + $0x50] sm:$0xff]  ;;  %v1198_v25 = vld [vmem:[%s4083_s14 + $0x48] sm:$0xff] }
 0x106   : > { %877 = vrot.lane.b32.xlu1 %v4196_v26, %s4773_s24  ;;  %3356 = vmatmul.mubr.msk.f32.vlgmr.msra.gmra.mxu1 %vm694_vm1, %v4196_v26  ;;  %s4490_s24 = scalar_lea.vmem %s4755_s2, %s4064_s19  ;;  %s4791_s19 = smov 96  }
 0x107   : > { %3366 = vmatprep.mubr.msk.f32.mxu1 %vm3888_vm0, %v3887_v1  ;;  %3359 = vmatpush3.xpose.msk.msra.mxu1 %vm768_vm2, %v693_v35 }
 0x108   : > { %3360 = vmatprep.subr.mxu1 %v3887_v1 }
 0x10b   : > { %3361 = vmatpush3.xpose.msk.msra.mxu1 %vm768_vm2, %v692_v36 }
 0x10c   : > { %3362 = vmatprep.subr.mxu1 %v3887_v1 }
 0x10f   : > { %3363 = vmatpush3.xpose.msk.msra.mxu1 %vm768_vm2, %v691_v37 }
 0x110   : > { %3364 = vmatprep.subr.mxu1 %v3887_v1 }
 0x113   : > { %3365 = vmatpush3.xpose.msk.msra.mxu1 %vm768_vm2, %v690_v38 }
 0x114   : > { %3369 = vmatprep.subr.mxu1 %v3887_v1 }
 0x178   : > { %v878_v46 = vpop.permute.xlu1 %877 }
 0x1c6   : > { %v764_v27 = vpop.f32.mrf.mxu1 }
 0x1c7   : > { %v769_v28 = vsel %vm768_vm2, %v764_v27, -inf }
 0x1c8   : > { %770 = vmax.xlane.f32.xlu0 %v769_v28  ;;  %v3357_v29 = vpop.f32.mrf.mxu1 }
 0x1c9   : > { %v4301_v29 = vld [vmem:[%s4760_s7 + $0x18] sm:$0xff] }
 0x251   : > { %v771_v30 = vpop.xlane.xlu0 %770 }
 0x252   : > { %v772_v31 = vsub.f32 %v764_v27, %v771_v30  ;;  %v1197_v27 = vld [vmem:[%s4083_s14 + $0x40] sm:$0xff] }
 0x254   : > { %v773_v32 = vmul.f32 1.442695, %v772_v31  ;;  %v4307_v31 = vld [vmem:[%s4760_s7 + $0x10] sm:$0xff] }
 0x256   : > { %3727 = vpow2.f32 %v773_v32 }
 0x263   : > { %v3728_v33 = vpop.eup %3727 }
 0x264   : > { %v775_v34 = vsel %vm768_vm2, %v3728_v33, 0.0 }
 0x265   : > { %776 = vadd.xlane.f32.xlu0 %v775_v34  ;;  %v4323_v34 = vld [vmem:[%s4760_s7] sm:$0xff] }
 0x2ee   : > { %v777_v39 = vpop.xlane.xlu0 %776 }
 0x2ef   : > { %3729 = vrcp.f32 %v777_v39 }
 0x2fc   : > { %v3730_v40 = vpop.eup %3729 }
 0x2fd   : > { %v779_v41 = vmul.f32 %v3730_v40, %v3728_v33  ;;  %v4316_v33 = vld [vmem:[%s4760_s7 + $0x8] sm:$0xff] }
 0x2ff   : > { %3367 = vmatmul.mubr.msk.f32.vlgmr.msra.gmra.mxu1 %vm768_vm2, %v779_v41 }
 0x300   : > { %3370 = vmatpush3.msra.mxu1 %v872_v42  ;;  %3377 = vmatprep.mubr.msk.f32.mxu1 %vm3888_vm0, %v3887_v1 }
 0x301   : > { %3371 = vmatprep.subr.mxu1 %v3887_v1 }
 0x302   : > { %3372 = vmatpush3.msra.mxu1 %v871_v43  ;;  %v1204_v43 = vld [vmem:[%s4210_s17 + $0x58] sm:$0xff] }
 0x303   : > { %3373 = vmatprep.subr.mxu1 %v3887_v1 }
 0x304   : > { %3374 = vmatpush3.msra.mxu1 %v870_v44  ;;  %v1203_v44 = vld [vmem:[%s4210_s17 + $0x50] sm:$0xff] }
 0x305   : > { %3375 = vmatprep.subr.mxu1 %v3887_v1 }
 0x306   : > { %3376 = vmatpush3.msra.mxu1 %v869_v45  ;;  %v1202_v45 = vld [vmem:[%s4210_s17 + $0x48] sm:$0xff] }
 0x307   : > { %3378 = vmatmul.mubr.msk.f32.vlgmr.msra.gmra.mxu1 %vm694_vm1, %v878_v46  ;;  %3391 = vmatprep.subr.mxu1 %v3887_v1  ;;  %v1201_v46 = vld [vmem:[%s4210_s17 + $0x40] sm:$0xff] }
 0x308   : > { %3399 = vmatprep.mubr.msk.f32.mxu1 %vm3888_vm0, %v3887_v1  ;;  %3392 = vmatpush3.msra.mxu1 %v4259_v61 }
 0x309   : > { %3393 = vmatprep.subr.mxu1 %v3887_v1 }
 0x30a   : > { %3394 = vmatpush3.msra.mxu1 %v4264_v62 }
 0x30b   : > { %3395 = vmatprep.subr.mxu1 %v3887_v1 }
 0x30c   : > { %3396 = vmatpush3.msra.mxu1 %v4271_v63 }
 0x30d   : > { %3397 = vmatprep.subr.mxu1 %v3887_v1 }
 0x30e   : > { %3398 = vmatpush3.msra.mxu1 %v4278_v6 }
 0x30f   : > { %3402 = vmatprep.subr.mxu1 %v3887_v1 }
 0x3bf   : > { %v4238_v47 = vpop.f32.mrf.mxu1 }
 0x3c1   : > { %v3368_v48 = vpop.f32.mrf.mxu1 }
 0x3c2   : > { %v4352_v48 = vld [vmem:[%s4760_s7 + $0x58] sm:$0xff] }
 0x3c7   : > { %v947_v49 = vpop.f32.mrf.mxu1 }
 0x3c8   : > { %v951_v50 = vsel %vm768_vm2, %v947_v49, -inf }
 0x3c9   : > { %952 = vmax.xlane.f32.xlu1 %v951_v50  ;;  %v3379_v51 = vpop.f32.mrf.mxu1  ;;  %v4364_v50 = vld [vmem:[%s4760_s7 + $0x48] sm:$0xff] }
 0x3ca   : > { %v4371_v51 = vld [vmem:[%s4760_s7 + $0x40] sm:$0xff] }
 0x452   : > { %v953_v52 = vpop.xlane.xlu1 %952 }
 0x453   : > { %v954_v53 = vsub.f32 %v947_v49, %v953_v52  ;;  %v4357_v49 = vld [vmem:[%s4760_s7 + $0x50] sm:$0xff] }
 0x455   : > { %v955_v54 = vmul.f32 1.442695, %v954_v53 }
 0x457   : > { %3731 = vpow2.f32 %v955_v54 }
 0x464   : > { %v3732_v55 = vpop.eup %3731 }
 0x465   : > { %v957_v56 = vsel %vm768_vm2, %v3732_v55, 0.0 }
 0x466   : > { %958 = vadd.xlane.f32.xlu0 %v957_v56 }
 0x47c   : > { %1205 = vrot.lane.b32.xlu0 %v4196_v26, %s4772_s23 }
 0x4ef   : > { %v959_v19 = vpop.xlane.xlu0 %958 }
 0x4f0   : > { %3733 = vrcp.f32 %v959_v19 }
 0x4f3   : > { %v1206_v28 = vpop.permute.xlu0 %1205 }
 0x4fd   : > { %v3734_v20 = vpop.eup %3733 }
 0x4fe   : > { %v961_v21 = vmul.f32 %v3734_v20, %v3732_v55  ;;  %v1454_v20 = vld [vmem:[%s4083_s14 + $0x68] sm:$0xff] }
 0x500   : > { %3389 = vmatmul.mubr.msk.f32.vlgmr.msra.gmra.mxu0 %vm768_vm2, %v961_v21  ;;  %v1453_v21 = vld [vmem:[%s4083_s14 + $0x60] sm:$0xff]  ;;  %s4793_s14 = smov 32  }
 0x501   : > { %3414 = vmatpush3.msra.mxu0 %v1200_v23  ;;  %3421 = vmatprep.mubr.msk.f32.mxu0 %vm3888_vm0, %v3887_v1 }
 0x502   : > { %3415 = vmatprep.subr.mxu0 %v3887_v1 }
 0x503   : > { %3416 = vmatpush3.msra.mxu0 %v1199_v24 }
 0x504   : > { %3417 = vmatprep.subr.mxu0 %v3887_v1 }
 0x505   : > { %3418 = vmatpush3.msra.mxu0 %v1198_v25 }
 0x506   : > { %3419 = vmatprep.subr.mxu0 %v3887_v1 }
 0x507   : > { %3420 = vmatpush3.msra.mxu0 %v1197_v27 }
 0x508   : > { %3422 = vmatmul.mubr.msk.f32.vlgmr.msra.gmra.mxu0 %vm694_vm1, %v1206_v28  ;;  %3435 = vmatprep.subr.mxu0 %v3887_v1 }
 0x509   : > { %3443 = vmatprep.mubr.msk.f32.mxu0 %vm3888_vm0, %v3887_v1  ;;  %3436 = vmatpush3.msra.mxu0 %v4352_v48 }
 0x50a   : > { %3437 = vmatprep.subr.mxu0 %v3887_v1 }
 0x50b   : > { %3438 = vmatpush3.msra.mxu0 %v4357_v49 }
 0x50c   : > { %3439 = vmatprep.subr.mxu0 %v3887_v1 }
 0x50d   : > { %3440 = vmatpush3.msra.mxu0 %v4364_v50 }
 0x50e   : > { %3441 = vmatprep.subr.mxu0 %v3887_v1 }
 0x50f   : > { %3442 = vmatpush3.msra.mxu0 %v4371_v51 }
 0x510   : > { %3446 = vmatprep.subr.mxu0 %v3887_v1 }
 0x5c0   : > { %v1043_v30 = vpop.f32.mrf.mxu0 }
 0x5c1   : > { %3400 = vmatmul.mubr.msk.f32.vlgmr.msra.gmra.mxu1 %vm694_vm1, %v1043_v30 }
 0x5c2   : > { %3403 = vmatpush3.msra.mxu1 %v4301_v29  ;;  %v3390_v32 = vpop.f32.mrf.mxu0  ;;  %3410 = vmatprep.mubr.msk.f32.mxu1 %vm3888_vm0, %v3887_v1 }
 0x5c3   : > { %3404 = vmatprep.subr.mxu1 %v3887_v1 }
 0x5c4   : > { %3405 = vmatpush3.msra.mxu1 %v4307_v31 }
 0x5c5   : > { %3406 = vmatprep.subr.mxu1 %v3887_v1 }
 0x5c6   : > { %3407 = vmatpush3.msra.mxu1 %v4316_v33 }
 0x5c7   : > { %3408 = vmatprep.subr.mxu1 %v3887_v1 }
 0x5c8   : > { %3409 = vmatpush3.msra.mxu1 %v4323_v34  ;;  %v1275_v35 = vpop.f32.mrf.mxu0 }
 0x5c9   : > { %3411 = vmatmul.mubr.msk.f32.vlgmr.msra.gmra.mxu1 %vm694_vm1, %v4238_v47  ;;  %v1279_v36 = vsel %vm768_vm2, %v1275_v35, -inf  ;;  %3424 = vmatprep.subr.mxu1 %v3887_v1 }
 0x5ca   : > { %1280 = vmax.xlane.f32.xlu0 %v1279_v36  ;;  %v3423_v37 = vpop.f32.mrf.mxu0  ;;  %3432 = vmatprep.mubr.msk.f32.mxu1 %vm3888_vm0, %v3887_v1 }
 0x5cb   : > { %3425 = vmatpush3.xpose.msk.msra.mxu1 %vm768_vm2, %v1204_v43  ;;  %v1457_v43 = vld [vmem:[%s4210_s17 + $0x60] sm:$0xff] }
 0x5cc   : > { %3426 = vmatprep.subr.mxu1 %v3887_v1 }
 0x5cf   : > { %3427 = vmatpush3.xpose.msk.msra.mxu1 %vm768_vm2, %v1203_v44  ;;  %v4413_v44 = vld [vmem:[%s4760_s7 + $0x78] sm:$0xff] }
 0x5d0   : > { %3428 = vmatprep.subr.mxu1 %v3887_v1 }
 0x5d3   : > { %3429 = vmatpush3.xpose.msk.msra.mxu1 %vm768_vm2, %v1202_v45  ;;  %v4418_v45 = vld [vmem:[%s4760_s7 + $0x70] sm:$0xff] }
 0x5d4   : > { %3430 = vmatprep.subr.mxu1 %v3887_v1 }
 0x5d7   : > { %3431 = vmatpush3.xpose.msk.msra.mxu1 %vm768_vm2, %v1201_v46  ;;  %v4425_v46 = vld [vmem:[%s4760_s7 + $0x68] sm:$0xff] }
 0x5d8   : > { %3457 = vmatprep.subr.mxu1 %v3887_v1 }
 0x653   : > { %v1281_v38 = vpop.xlane.xlu0 %1280 }
 0x654   : > { %v1282_v39 = vsub.f32 %v1275_v35, %v1281_v38 }
 0x656   : > { %v1283_v40 = vmul.f32 1.442695, %v1282_v39 }
 0x658   : > { %3735 = vpow2.f32 %v1283_v40  ;;  %v1460_v40 = vld [vmem:[%s4210_s17 + $0x78] sm:$0xff] }
 0x665   : > { %v3736_v41 = vpop.eup %3735 }
 0x666   : > { %v1285_v42 = vsel %vm768_vm2, %v3736_v41, 0.0 }
 0x667   : > { %1286 = vadd.xlane.f32.xlu1 %v1285_v42  ;;  %v1458_v42 = vld [vmem:[%s4210_s17 + $0x68] sm:$0xff] }
 0x678   : > { %1461 = vrot.lane.b32.xlu1 %v4196_v26, %s4774_s4  ;;  %s544_s4 = scalar_lea.vmem [#allocation2], %s4775_s25 }
 0x681   : > { %v1120_v47 = vpop.f32.mrf.mxu1 }
 0x683   : > { %v3401_v26 = vpop.f32.mrf.mxu1 }
 0x689   : > { %v1193_v52 = vpop.f32.mrf.mxu1 }
 0x68a   : > { %v1194_v53 = vadd.f32 %v1193_v52, %v1120_v47  ;;  %v4432_v47 = vld [vmem:[%s4760_s7 + $0x60] sm:$0xff] }
 0x68b   : > { %v3412_v54 = vpop.f32.mrf.mxu1 }
 0x6f0   : > { %v1287_v55 = vpop.xlane.xlu1 %1286 }
 0x6f1   : > { %3737 = vrcp.f32 %v1287_v55 }
 0x6f4   : > { %v1462_v23 = vpop.permute.xlu1 %1461 }
 0x6fe   : > { %v3738_v56 = vpop.eup %3737 }
 0x6ff   : > { %v1289_v57 = vmul.f32 %v3738_v56, %v3736_v41  ;;  %v1459_v41 = vld [vmem:[%s4210_s17 + $0x70] sm:$0xff] }
 0x701   : > { %3433 = vmatmul.mubr.msk.f32.vlgmr.msra.gmra.mxu1 %vm768_vm2, %v1289_v57 }
 0x702   : > { %3465 = vmatprep.mubr.msk.f32.mxu1 %vm3888_vm0, %v3887_v1  ;;  %3458 = vmatpush3.xpose.msk.msra.mxu1 %vm768_vm2, %v1460_v40 }
 0x703   : > { %3459 = vmatprep.subr.mxu1 %v3887_v1 }
 0x706   : > { %3460 = vmatpush3.xpose.msk.msra.mxu1 %vm768_vm2, %v1459_v41  ;;  %v2004_v41 = vld [vmem:[%s4516_s18 + $0x38] sm:$0xff] }
 0x707   : > { %3461 = vmatprep.subr.mxu1 %v3887_v1 }
 0x70a   : > { %3462 = vmatpush3.xpose.msk.msra.mxu1 %vm768_vm2, %v1458_v42  ;;  %v2003_v42 = vld [vmem:[%s4516_s18 + $0x30] sm:$0xff] }
 0x70b   : > { %3463 = vmatprep.subr.mxu1 %v3887_v1 }
 0x70e   : > { %3464 = vmatpush3.xpose.msk.msra.mxu1 %vm768_vm2, %v1457_v43  ;;  %v2002_v43 = vld [vmem:[%s4516_s18 + $0x28] sm:$0xff] }
 0x70f   : > { %3514 = vmatprep.subr.mxu1 %v3887_v1 }
 0x7c1   : > { %v1371_v59 = vpop.f32.mrf.mxu1 }
 0x7c2   : > { %3444 = vmatmul.mubr.msk.f32.vlgmr.msra.gmra.mxu0 %vm694_vm1, %v1371_v59  ;;  %v1823_v59 = vld [vmem:[%s4516_s18 + $0x18] sm:$0xff] }
 0x7c3   : > { %3447 = vmatpush3.msra.mxu0 %v1456_v58  ;;  %v3434_v19 = vpop.f32.mrf.mxu1  ;;  %3454 = vmatprep.mubr.msk.f32.mxu0 %vm3888_vm0, %v3887_v1 }
 0x7c4   : > { %3448 = vmatprep.subr.mxu0 %v3887_v1  ;;  %v1821_v19 = vld [vmem:[%s4516_s18 + $0x8] sm:$0xff] }
 0x7c5   : > { %3449 = vmatpush3.msra.mxu0 %v1455_v60  ;;  %v1822_v60 = vld [vmem:[%s4516_s18 + $0x10] sm:$0xff] }
 0x7c6   : > { %3450 = vmatprep.subr.mxu0 %v3887_v1 }
 0x7c7   : > { %3451 = vmatpush3.msra.mxu0 %v1454_v20  ;;  %v1820_v20 = vld [vmem:[%s4516_s18] sm:$0xff] }
 0x7c8   : > { %3452 = vmatprep.subr.mxu0 %v3887_v1 }
 0x7c9   : > { %3453 = vmatpush3.msra.mxu0 %v1453_v21 }
 0x7ca   : > { %3455 = vmatmul.mubr.msk.f32.vlgmr.msra.gmra.mxu0 %vm694_vm1, %v1462_v23  ;;  %3468 = vmatprep.subr.mxu0 %v3887_v1 }
 0x7cb   : > { %3476 = vmatprep.mubr.msk.f32.mxu0 %vm3888_vm0, %v3887_v1  ;;  %3469 = vmatpush3.msra.mxu0 %v4413_v44 }
 0x7cc   : > { %3470 = vmatprep.subr.mxu0 %v3887_v1 }
 0x7cd   : > { %3471 = vmatpush3.msra.mxu0 %v4418_v45 }
 0x7ce   : > { %3472 = vmatprep.subr.mxu0 %v3887_v1 }
 0x7cf   : > { %3473 = vmatpush3.msra.mxu0 %v4425_v46 }
 0x7d0   : > { %3474 = vmatprep.subr.mxu0 %v3887_v1 }
 0x7d1   : > { %3475 = vmatpush3.msra.mxu0 %v4432_v47 }
 0x7d2   : > { %3479 = vmatprep.subr.mxu0 %v3887_v1 }
 0x882   : > { %v1448_v24 = vpop.f32.mrf.mxu0 }
 0x883   : > { %v4394_v25 = vadd.f32 %v1448_v24, %v1194_v53 }
 0x884   : > { %v3445_v27 = vpop.f32.mrf.mxu0 }
 0x885   : > { %v1999_v27 = vld [vmem:[%s4490_s24 + $0x30] sm:$0xff] }
 0x88a   : > { %v1531_v28 = vpop.f32.mrf.mxu0 }
 0x88b   : > { %v1535_v30 = vsel %vm768_vm2, %v1531_v28, -inf }
 0x88c   : > { %1536 = vmax.xlane.f32.xlu1 %v1535_v30  ;;  %v3456_v32 = vpop.f32.mrf.mxu0  ;;  %v1997_v30 = vld [vmem:[%s4490_s24 + $0x20] sm:$0xff] }
 0x915   : > { %v1537_v35 = vpop.xlane.xlu1 %1536 }
 0x916   : > { %v1538_v36 = vsub.f32 %v1531_v28, %v1537_v35  ;;  %v1998_v28 = vld [vmem:[%s4490_s24 + $0x28] sm:$0xff] }
 0x918   : > { %v1539_v37 = vmul.f32 1.442695, %v1538_v36 }
 0x91a   : > { %3739 = vpow2.f32 %v1539_v37 }
 0x927   : > { %v3740_v38 = vpop.eup %3739 }
 0x928   : > { %v1541_v39 = vsel %vm768_vm2, %v3740_v38, 0.0 }
 0x929   : > { %1542 = vadd.xlane.f32.xlu0 %v1541_v39 }
 0x9b2   : > { %v1543_v26 = vpop.xlane.xlu0 %1542 }
 0x9b3   : > { %3741 = vrcp.f32 %v1543_v26  ;;  %v2001_v26 = vld [vmem:[%s4516_s18 + $0x20] sm:$0xff] }
 0x9c0   : > { %v3742_v52 = vpop.eup %3741 }
 0x9c1   : > { %v1545_v53 = vmul.f32 %v3742_v52, %v3740_v38 }
 0x9c3   : > { %3466 = vmatmul.mubr.msk.f32.vlgmr.msra.gmra.mxu1 %vm768_vm2, %v1545_v53 }
 0x9c4   : > { %3522 = vmatprep.mubr.msk.f32.mxu1 %vm3888_vm0, %v3887_v1 }
 0xa83   : > { %v1627_v54 = vpop.f32.mrf.mxu1 }
 0xa84   : > { %3477 = vmatmul.mubr.msk.f32.vlgmr.msra.gmra.mxu0 %vm694_vm1, %v1627_v54 }
 0xa85   : > { %3480 = vmatpush3.msra.mxu0 %v4038_v0  ;;  %v3467_v55 = vpop.f32.mrf.mxu1  ;;  %3511 = vmatprep.mubr.msk.f32.mxu0 %vm3888_vm0, %v3887_v1  ;;  %v4478_v0 = vld [vmem:[%s567_s20] sm:$0xff]  ;;  %s2874_s20 = sshll.u32 %s544_s4, 4  ;;  %s2875_s20 = int_to_ptr.vmem [resolvable:$true] %s2874_s20 }
 0xa86   : > { %3481 = vmatprep.subr.mxu0 %v3887_v1  ;;  %v2328_v55 = vld [vmem:[%s4490_s24 + $0x58] sm:$0xff] }
 0xa87   : > { %3482 = vmatpush3.msra.mxu0 %v4045_v2  ;;  %v1819_v2 = vld [vmem:[%s4490_s24 + $0x18] sm:$0xff] }
 0xa88   : > { %3483 = vmatprep.subr.mxu0 %v3887_v1  ;;  %3515 = vmatpush3.msra.mxu1 %v1819_v2  ;;  %v2327_v2 = vld [vmem:[%s4490_s24 + $0x50] sm:$0xff] }
 0xa89   : > { %3484 = vmatpush3.msra.mxu0 %v4058_v3  ;;  %3516 = vmatprep.subr.mxu1 %v3887_v1  ;;  %v1818_v3 = vld [vmem:[%s4490_s24 + $0x10] sm:$0xff] }
 0xa8a   : > { %3485 = vmatprep.subr.mxu0 %v3887_v1  ;;  %3517 = vmatpush3.msra.mxu1 %v1818_v3  ;;  %v2326_v3 = vld [vmem:[%s4490_s24 + $0x48] sm:$0xff] }
 0xa8b   : > { %3486 = vmatpush3.msra.mxu0 %v4070_v4  ;;  %3518 = vmatprep.subr.mxu1 %v3887_v1  ;;  %v1817_v4 = vld [vmem:[%s4490_s24 + $0x8] sm:$0xff] }
 0xa8c   : > { %3487 = vmatprep.subr.mxu0 %v3887_v1  ;;  %3519 = vmatpush3.msra.mxu1 %v1817_v4  ;;  %v2325_v4 = vld [vmem:[%s4490_s24 + $0x40] sm:$0xff] }
 0xa8d   : > { %3488 = vmatpush3.msra.mxu0 %v4077_v5  ;;  %3520 = vmatprep.subr.mxu1 %v3887_v1  ;;  %v1816_v5 = vld [vmem:[%s4490_s24] sm:$0xff] }
 0xa8e   : > { %3489 = vmatprep.subr.mxu0 %v3887_v1  ;;  %3521 = vmatpush3.msra.mxu1 %v1816_v5 }
 0xa8f   : > { %3490 = vmatpush3.msra.mxu0 %v4091_v7  ;;  %3525 = vmatprep.subr.mxu1 %v3887_v1 }
 0xa90   : > { %3491 = vmatprep.subr.mxu0 %v3887_v1 }
 0xa91   : > { %3492 = vmatpush3.msra.mxu0 %v4099_v8 }
 0xa92   : > { %3493 = vmatprep.subr.mxu0 %v3887_v1 }
 0xa93   : > { %3494 = vmatpush3.msra.mxu0 %v4106_v9 }
 0xa94   : > { %3495 = vmatprep.subr.mxu0 %v3887_v1 }
 0xa95   : > { %3496 = vmatpush3.msra.mxu0 %v4114_v10 }
 0xa96   : > { %3497 = vmatprep.subr.mxu0 %v3887_v1 }
 0xa97   : > { %3498 = vmatpush3.msra.mxu0 %v4121_v11 }
 0xa98   : > { %3499 = vmatprep.subr.mxu0 %v3887_v1 }
 0xa99   : > { %3500 = vmatpush3.msra.mxu0 %v4130_v12 }
 0xa9a   : > { %3501 = vmatprep.subr.mxu0 %v3887_v1 }
 0xa9b   : > { %3502 = vmatpush3.msra.mxu0 %v4137_v13 }
 0xa9c   : > { %3503 = vmatprep.subr.mxu0 %v3887_v1 }
 0xa9d   : > { %3504 = vmatpush3.msra.mxu0 %v4146_v14 }
 0xa9e   : > { %3505 = vmatprep.subr.mxu0 %v3887_v1 }
 0xa9f   : > { %3506 = vmatpush3.msra.mxu0 %v4154_v15 }
 0xaa0   : > { %3507 = vmatprep.subr.mxu0 %v3887_v1 }
 0xaa1   : > { %3508 = vmatpush3.msra.mxu0 %v4161_v16 }
 0xaa2   : > { %3509 = vmatprep.subr.mxu0 %v3887_v1 }
 0xaa3   : > { %3510 = vmatpush3.msra.mxu0 %v4173_v17 }
 0xaa4   : > { %3512 = vmatmul.mubr.f32.vlgmr.msra.gmra.mxu0 %v4478_v0  ;;  %3547 = vmatprep.subr.mxu0 %v3887_v1 }
 0xaa5   : > { %3555 = vmatprep.mubr.msk.f32.mxu0 %vm3888_vm0, %v3887_v1  ;;  %3548 = vmatpush3.xpose.msk.msra.mxu0 %vm768_vm2, %v2004_v41 }
 0xaa6   : > { %3549 = vmatprep.subr.mxu0 %v3887_v1 }
 0xaa9   : > { %3550 = vmatpush3.xpose.msk.msra.mxu0 %vm768_vm2, %v2003_v42 }
 0xaaa   : > { %3551 = vmatprep.subr.mxu0 %v3887_v1 }
 0xaad   : > { %3552 = vmatpush3.xpose.msk.msra.mxu0 %vm768_vm2, %v2002_v43 }
 0xaae   : > { %3553 = vmatprep.subr.mxu0 %v3887_v1 }
 0xab1   : > { %3554 = vmatpush3.xpose.msk.msra.mxu0 %vm768_vm2, %v2001_v26 }
 0xab2   : > { %3580 = vmatprep.subr.mxu0 %v3887_v1 }
 0xb44   : > { %v1704_v7 = vpop.f32.mrf.mxu0 }
 0xb45   : > { %v4501_v8 = vadd.f32 %v1704_v7, %v4394_v25  ;;  %v2000_v25 = vld [vmem:[%s4490_s24 + $0x38] sm:$0xff] }
 0xb46   : > { %v3478_v9 = vpop.f32.mrf.mxu0 }
 0xb64   : > { %v1811_v10 = vpop.f32.mrf.mxu0 }
 0xb65   : > { %v1812_v11 = vadd.f32 %v4193_v22, %v1811_v10  ;;  %v2332_v10 = vld [vmem:[%s4516_s18 + $0x58] sm:$0xff] }
 0xb66   : > { %v3513_v12 = vpop.f32.mrf.mxu0 }
 0xb67   : > { %v4504_v13 = vmul.f32 0.17677669, %v1812_v11  ;;  %v2331_v11 = vld [vmem:[%s4516_s18 + $0x50] sm:$0xff]  ;;  %v2330_v12 = vld [vmem:[%s4516_s18 + $0x48] sm:$0xff] }
 0xb69   : > { %3523 = vmatmul.mubr.msk.f32.vlgmr.msra.gmra.mxu1 %vm694_vm1, %v4504_v13 }
 0xb6a   : > { %3533 = vmatprep.mubr.msk.f32.mxu1 %vm3888_vm0, %v3887_v1  ;;  %3526 = vmatpush3.xpose.msk.msra.mxu1 %vm768_vm2, %v1823_v59 }
 0xb6b   : > { %3527 = vmatprep.subr.mxu1 %v3887_v1 }
 0xb6e   : > { %3528 = vmatpush3.xpose.msk.msra.mxu1 %vm768_vm2, %v1822_v60 }
 0xb6f   : > { %3529 = vmatprep.subr.mxu1 %v3887_v1 }
 0xb72   : > { %3530 = vmatpush3.xpose.msk.msra.mxu1 %vm768_vm2, %v1821_v19  ;;  %v2583_v19 = vld [vmem:[%s4490_s24 + $0x70] sm:$0xff] }
 0xb73   : > { %3531 = vmatprep.subr.mxu1 %v3887_v1 }
 0xb76   : > { %3532 = vmatpush3.xpose.msk.msra.mxu1 %vm768_vm2, %v1820_v20 }
 0xb77   : > { %3536 = vmatprep.subr.mxu1 %v3887_v1 }
 0xc29   : > { %v1893_v14 = vpop.f32.mrf.mxu1 }
 0xc2a   : > { %v1897_v15 = vsel %vm768_vm2, %v1893_v14, -inf }
 0xc2b   : > { %1898 = vmax.xlane.f32.xlu0 %v1897_v15  ;;  %v3524_v16 = vpop.f32.mrf.mxu1 }
 0xcb4   : > { %v1899_v17 = vpop.xlane.xlu0 %1898 }
 0xcb5   : > { %v1900_v56 = vsub.f32 %v1893_v14, %v1899_v17  ;;  %v2329_v14 = vld [vmem:[%s4516_s18 + $0x40] sm:$0xff] }
 0xcb7   : > { %v1901_v57 = vmul.f32 1.442695, %v1900_v56 }
 0xcb9   : > { %3743 = vpow2.f32 %v1901_v57 }
 0xcc6   : > { %v3744_v22 = vpop.eup %3743 }
 0xcc7   : > { %v1903_v58 = vsel %vm768_vm2, %v3744_v22, 0.0 }
 0xcc8   : > { %1904 = vadd.xlane.f32.xlu0 %v1903_v58 }
 0xcde   : > { %2005 = vrot.lane.b32.xlu0 %v4504_v13, %s4791_s19  ;;  %s3892_s19 = smov [#allocation2]  }
 0xd51   : > { %v1905_v21 = vpop.xlane.xlu0 %1904 }
 0xd52   : > { %3745 = vrcp.f32 %v1905_v21  ;;  %v2582_v21 = vld [vmem:[%s4490_s24 + $0x68] sm:$0xff] }
 0xd55   : > { %v2006_v32 = vpop.permute.xlu0 %2005 }
 0xd5f   : > { %v3746_v23 = vpop.eup %3745 }
 0xd60   : > { %v1907_v24 = vmul.f32 %v3746_v23, %v3744_v22  ;;  %v2581_v23 = vld [vmem:[%s4490_s24 + $0x60] sm:$0xff] }
 0xd62   : > { %3534 = vmatmul.mubr.msk.f32.vlgmr.msra.gmra.mxu1 %vm768_vm2, %v1907_v24 }
 0xd63   : > { %3537 = vmatpush3.msra.mxu1 %v2000_v25  ;;  %3544 = vmatprep.mubr.msk.f32.mxu1 %vm3888_vm0, %v3887_v1 }
 0xd64   : > { %3538 = vmatprep.subr.mxu1 %v3887_v1 }
 0xd65   : > { %3539 = vmatpush3.msra.mxu1 %v1999_v27 }
 0xd66   : > { %3540 = vmatprep.subr.mxu1 %v3887_v1 }
 0xd67   : > { %3541 = vmatpush3.msra.mxu1 %v1998_v28 }
 0xd68   : > { %3542 = vmatprep.subr.mxu1 %v3887_v1 }
 0xd69   : > { %3543 = vmatpush3.msra.mxu1 %v1997_v30 }
 0xd6a   : > { %3545 = vmatmul.mubr.msk.f32.vlgmr.msra.gmra.mxu1 %vm694_vm1, %v2006_v32  ;;  %3558 = vmatprep.subr.mxu1 %v3887_v1 }
 0xd6b   : > { %3559 = vmatpush3.msra.mxu1 %v4259_v61  ;;  %3566 = vmatprep.mubr.msk.f32.mxu1 %vm3888_vm0, %v3887_v1 }
 0xd6c   : > { %3560 = vmatprep.subr.mxu1 %v3887_v1 }
 0xd6d   : > { %3561 = vmatpush3.msra.mxu1 %v4264_v62 }
 0xd6e   : > { %3562 = vmatprep.subr.mxu1 %v3887_v1 }
 0xd6f   : > { %3563 = vmatpush3.msra.mxu1 %v4271_v63 }
 0xd70   : > { %3564 = vmatprep.subr.mxu1 %v3887_v1 }
 0xd71   : > { %3565 = vmatpush3.msra.mxu1 %v4278_v6 }
 0xd72   : > { %3569 = vmatprep.subr.mxu1 %v3887_v1 }
 0xe22   : > { %v4554_v35 = vpop.f32.mrf.mxu1 }
 0xe24   : > { %v3535_v61 = vpop.f32.mrf.mxu1 }
 0xe2a   : > { %v2075_v36 = vpop.f32.mrf.mxu1 }
 0xe2b   : > { %v2079_v37 = vsel %vm768_vm2, %v2075_v36, -inf }
 0xe2c   : > { %2080 = vmax.xlane.f32.xlu1 %v2079_v37  ;;  %v3546_v62 = vpop.f32.mrf.mxu1 }
 0xe2d   : > { %v2587_v62 = vld [vmem:[%s4516_s18 + $0x70] sm:$0xff] }
 0xe3d   : > { %2333 = vrot.lane.b32.xlu1 %v4504_v13, %s4792_s30  ;;  %s3767_s30 = sshll.u32 %s3892_s19, 4  ;;  %s3768_s30 = int_to_ptr.vmem [resolvable:$false] %s3767_s30 }
 0xe3e   : > { %s3769_s25 = scalar_lea.vmem %s3768_s30, 256  ;;  %p3770_p4 = scmp.lt.s32.totalorder %s2875_s20, %s3768_s30 }
 0xeb5   : > { %v2081_v63 = vpop.xlane.xlu1 %2080 }
 0xeb6   : > { %v2082_v38 = vsub.f32 %v2075_v36, %v2081_v63  ;;  %v2586_v63 = vld [vmem:[%s4516_s18 + $0x68] sm:$0xff] }
 0xeb8   : > { %v2083_v6 = vmul.f32 1.442695, %v2082_v38  ;;  %v2585_v38 = vld [vmem:[%s4516_s18 + $0x60] sm:$0xff] }
 0xeb9   : > { %v2334_v5 = vpop.permute.xlu1 %2333 }
 0xeba   : > { %3747 = vpow2.f32 %v2083_v6 }
 0xec7   : > { %v3748_v39 = vpop.eup %3747 }
 0xec8   : > { %v2085_v40 = vsel %vm768_vm2, %v3748_v39, 0.0 }
 0xec9   : > { %2086 = vadd.xlane.f32.xlu0 %v2085_v40 }
 0xf52   : > { %v2087_v52 = vpop.xlane.xlu0 %2086 }
 0xf53   : > { %3749 = vrcp.f32 %v2087_v52 }
 0xf60   : > { %v3750_v53 = vpop.eup %3749 }
 0xf61   : > { %v2089_v54 = vmul.f32 %v3750_v53, %v3748_v39 }
 0xf63   : > { %3556 = vmatmul.mubr.msk.f32.vlgmr.msra.gmra.mxu0 %vm768_vm2, %v2089_v54 }
 0xf64   : > { %3581 = vmatpush3.msra.mxu0 %v2328_v55  ;;  %3588 = vmatprep.mubr.msk.f32.mxu0 %vm3888_vm0, %v3887_v1 }
 0xf65   : > { %3582 = vmatprep.subr.mxu0 %v3887_v1 }
 0xf66   : > { %3583 = vmatpush3.msra.mxu0 %v2327_v2 }
 0xf67   : > { %3584 = vmatprep.subr.mxu0 %v3887_v1 }
 0xf68   : > { %3585 = vmatpush3.msra.mxu0 %v2326_v3 }
 0xf69   : > { %3586 = vmatprep.subr.mxu0 %v3887_v1 }
 0xf6a   : > { %3587 = vmatpush3.msra.mxu0 %v2325_v4 }
 0xf6b   : > { %3589 = vmatmul.mubr.msk.f32.vlgmr.msra.gmra.mxu0 %vm694_vm1, %v2334_v5  ;;  %3602 = vmatprep.subr.mxu0 %v3887_v1 }
 0xf6c   : > { %3603 = vmatpush3.msra.mxu0 %v4352_v48  ;;  %3610 = vmatprep.mubr.msk.f32.mxu0 %vm3888_vm0, %v3887_v1 }
 0xf6d   : > { %3604 = vmatprep.subr.mxu0 %v3887_v1 }
 0xf6e   : > { %3605 = vmatpush3.msra.mxu0 %v4357_v49 }
 0xf6f   : > { %3606 = vmatprep.subr.mxu0 %v3887_v1 }
 0xf70   : > { %3607 = vmatpush3.msra.mxu0 %v4364_v50 }
 0xf71   : > { %3608 = vmatprep.subr.mxu0 %v3887_v1 }
 0xf72   : > { %3609 = vmatpush3.msra.mxu0 %v4371_v51 }
 0xf73   : > { %3613 = vmatprep.subr.mxu0 %v3887_v1 }
0x1023   : > { %v2171_v7 = vpop.f32.mrf.mxu0 }
0x1024   : > { %3567 = vmatmul.mubr.msk.f32.vlgmr.msra.gmra.mxu1 %vm694_vm1, %v2171_v7 }
0x1025   : > { %3570 = vmatpush3.msra.mxu1 %v4301_v29  ;;  %v3557_v48 = vpop.f32.mrf.mxu0  ;;  %3577 = vmatprep.mubr.msk.f32.mxu1 %vm3888_vm0, %v3887_v1 }
0x1026   : > { %3571 = vmatprep.subr.mxu1 %v3887_v1 }
0x1027   : > { %3572 = vmatpush3.msra.mxu1 %v4307_v31 }
0x1028   : > { %3573 = vmatprep.subr.mxu1 %v3887_v1 }
0x1029   : > { %3574 = vmatpush3.msra.mxu1 %v4316_v33 }
0x102a   : > { %3575 = vmatprep.subr.mxu1 %v3887_v1 }
0x102b   : > { %3576 = vmatpush3.msra.mxu1 %v4323_v34  ;;  %v2403_v49 = vpop.f32.mrf.mxu0 }
0x102c   : > { %3578 = vmatmul.mubr.msk.f32.vlgmr.msra.gmra.mxu1 %vm694_vm1, %v4554_v35  ;;  %v2407_v29 = vsel %vm768_vm2, %v2403_v49, -inf  ;;  %3591 = vmatprep.subr.mxu1 %v3887_v1 }
0x102d   : > { %2408 = vmax.xlane.f32.xlu1 %v2407_v29  ;;  %v3590_v31 = vpop.f32.mrf.mxu0  ;;  %3599 = vmatprep.mubr.msk.f32.mxu1 %vm3888_vm0, %v3887_v1 }
0x102e   : > { %3592 = vmatpush3.xpose.msk.msra.mxu1 %vm768_vm2, %v2332_v10 }
0x102f   : > { %3593 = vmatprep.subr.mxu1 %v3887_v1 }
0x1032   : > { %3594 = vmatpush3.xpose.msk.msra.mxu1 %vm768_vm2, %v2331_v11 }
0x1033   : > { %3595 = vmatprep.subr.mxu1 %v3887_v1 }
0x1036   : > { %3596 = vmatpush3.xpose.msk.msra.mxu1 %vm768_vm2, %v2330_v12 }
0x1037   : > { %3597 = vmatprep.subr.mxu1 %v3887_v1 }
0x103a   : > { %3598 = vmatpush3.xpose.msk.msra.mxu1 %vm768_vm2, %v2329_v14 }
0x103b   : > { %3624 = vmatprep.subr.mxu1 %v3887_v1 }
0x10b6   : > { %v2409_v33 = vpop.xlane.xlu1 %2408 }
0x10b7   : > { %v2410_v50 = vsub.f32 %v2403_v49, %v2409_v33  ;;  %v3116_v33 = vld [vmem:[%s4763_s10] ss:$0 sm:$0xff] }
0x10b9   : > { %v2411_v51 = vmul.f32 1.442695, %v2410_v50 }
0x10bb   : > { %3751 = vpow2.f32 %v2411_v51  ;;  %v3117_v51 = vld [vmem:[%s4764_s11] ss:$0 sm:$0xff] }
0x10c8   : > { %v3752_v34 = vpop.eup %3751 }
0x10c9   : > { %v2413_v9 = vsel %vm768_vm2, %v3752_v34, 0.0 }
0x10ca   : > { %2414 = vadd.xlane.f32.xlu0 %v2413_v9 }
0x10e0   : > { %2589 = vrot.lane.b32.xlu0 %v4504_v13, %s4793_s14  ;;  %v2584_v13 = vld [vmem:[%s4490_s24 + $0x78] sm:$0xff]  ;;  %s3148_s24 = sshll.u32 %s3873_s29, 1 }
0x10e4   : > { %v2248_v15 = vpop.f32.mrf.mxu1 }
0x10e6   : > { %v3568_v16 = vpop.f32.mrf.mxu1 }
0x10ec   : > { %v2321_v17 = vpop.f32.mrf.mxu1 }
0x10ed   : > { %v2322_v56 = vadd.f32 %v2321_v17, %v2248_v15 }
0x10ee   : > { %v3579_v57 = vpop.f32.mrf.mxu1 }
0x1153   : > { %v2415_v22 = vpop.xlane.xlu0 %2414 }
0x1154   : > { %3753 = vrcp.f32 %v2415_v22 }
0x1157   : > { %v2590_v24 = vpop.permute.xlu0 %2589 }
0x1161   : > { %v3754_v58 = vpop.eup %3753 }
0x1162   : > { %v2417_v59 = vmul.f32 %v3754_v58, %v3752_v34 }
0x1164   : > { %3600 = vmatmul.mubr.msk.f32.vlgmr.msra.gmra.mxu1 %vm768_vm2, %v2417_v59 }
0x1165   : > { %3632 = vmatprep.mubr.msk.f32.mxu1 %vm3888_vm0, %v3887_v1 }
0x1224   : > { %v2499_v60 = vpop.f32.mrf.mxu1 }
0x1225   : > { %3611 = vmatmul.mubr.msk.f32.vlgmr.msra.gmra.mxu0 %vm694_vm1, %v2499_v60 }
0x1226   : > { %3614 = vmatpush3.msra.mxu0 %v2584_v13  ;;  %v3601_v20 = vpop.f32.mrf.mxu1  ;;  %3621 = vmatprep.mubr.msk.f32.mxu0 %vm3888_vm0, %v3887_v1 }
0x1227   : > { %3615 = vmatprep.subr.mxu0 %v3887_v1 }
0x1228   : > { %3616 = vmatpush3.msra.mxu0 %v2583_v19 }
0x1229   : > { %3617 = vmatprep.subr.mxu0 %v3887_v1 }
0x122a   : > { %3618 = vmatpush3.msra.mxu0 %v2582_v21 }
0x122b   : > { %3619 = vmatprep.subr.mxu0 %v3887_v1 }
0x122c   : > { %3620 = vmatpush3.msra.mxu0 %v2581_v23 }
0x122d   : > { %3622 = vmatmul.mubr.msk.f32.vlgmr.msra.gmra.mxu0 %vm694_vm1, %v2590_v24  ;;  %3635 = vmatprep.subr.mxu0 %v3887_v1 }
0x122e   : > { %3636 = vmatpush3.msra.mxu0 %v4413_v44  ;;  %3643 = vmatprep.mubr.msk.f32.mxu0 %vm3888_vm0, %v3887_v1  ;;  %v1709_v44 = vadd.f32 %v4501_v8, %v4176_v18  ;;  %v2588_v8 = vld [vmem:[%s4516_s18 + $0x78] sm:$0xff]  ;;  %s4679_s18 = sadd.s32 %s3869_s28, %s3148_s24  ;;  %s2854_s28 = scalar_lea.sflag [#allocation3], %s4671_s16 }
0x122f   : > { %3637 = vmatprep.subr.mxu0 %v3887_v1  ;;  %3625 = vmatpush3.xpose.msk.msra.mxu1 %vm768_vm2, %v2588_v8  ;;  %s4776_s14 = sshll.u32 %s4679_s18, 7  ;;  %s3763_s24 = scalar_lea.vmem %s2875_s20, 128 }
0x1230   : > { %3638 = vmatpush3.msra.mxu0 %v4418_v45  ;;  %v3115_v45 = vld [vmem:[%s4762_s9] ss:$0 sm:$0xff]  ;;  %3626 = vmatprep.subr.mxu1 %v3887_v1  ;;  %s2872_s17 = scalar_lea.hbm %s4765_s12, %s4776_s14  ;;  %p3764_p0 = scmp.ne.s32.totalorder %s2875_s20, %s3763_s24 }
0x1231   : > { %3639 = vmatprep.subr.mxu0 %v3887_v1  ;;  %v1716_v35 = vadd.f32 %v3115_v45, %v1709_v44  ;;  %p3771_p5 = scmp.lt.s32.totalorder %s3769_s25, %s3763_s24 }
0x1232   : > { %3640 = vmatpush3.msra.mxu0 %v4425_v46  ;;  %p3765_p1 = pnand %p3764_p0, %p4015_p3 }
0x1233   : > { %3641 = vmatprep.subr.mxu0 %v3887_v1  ;;  %3627 = vmatpush3.xpose.msk.msra.mxu1 %vm768_vm2, %v2587_v62  ;;  %p3772_p6 = por %p3771_p5, %p3770_p4 }
0x1234   : > { %3642 = vmatpush3.msra.mxu0 %v4432_v47  ;;  %3628 = vmatprep.subr.mxu1 %v3887_v1  ;;  %p3766_p2 = pneg %p3765_p1 }
0x1236   : > { %p3773_p7 = pnand %p3772_p6, %p3766_p2 }
0x1237   : > { %3629 = vmatpush3.xpose.msk.msra.mxu1 %vm768_vm2, %v2586_v63 }
0x1238   : > { %3630 = vmatprep.subr.mxu1 %v3887_v1 }
0x123b   : > { %3631 = vmatpush3.xpose.msk.msra.mxu1 %vm768_vm2, %v2585_v38 }
0x12e5   : > { %v2576_v25 = vpop.f32.mrf.mxu0 }
0x12e6   : > { %v2580_v27 = vadd.f32 %v2576_v25, %v2322_v56 }
0x12e7   : > { %v3612_v28 = vpop.f32.mrf.mxu0 }
0x12ed   : > { %v2659_v30 = vpop.f32.mrf.mxu0 }
0x12ee   : > { %v2663_v32 = vsel %vm768_vm2, %v2659_v30, -inf }
0x12ef   : > { %2664 = vmax.xlane.f32.xlu1 %v2663_v32  ;;  %v3623_v46 = vpop.f32.mrf.mxu0 }
0x12f3   : > { %1717 = vadd.xlane.f32.xlu1 %v1716_v35 }
0x1378   : > { %v2665_v47 = vpop.xlane.xlu1 %2664 }
0x1379   : > { %v2666_v61 = vsub.f32 %v2659_v30, %v2665_v47 }
0x137b   : > { %v2667_v36 = vmul.f32 1.442695, %v2666_v61 }
0x137c   : > { %v1718_v43 = vpop.xlane.xlu1 %1717 }
0x137d   : > { %3755 = vpow2.f32 %v2667_v36  ;;  %v1720_v52 = vmul.f32 0.0078125, %v1718_v43 }
0x137f   : > { %v1721_v55 = vsub.f32 %v1716_v35, %v1720_v52 }
0x1381   : > { %v1722_v3 = vmul.f32 %v1721_v55, %v1721_v55 }
0x138a   : > { %v3756_v37 = vpop.eup %3755 }
0x138b   : > { %v2669_v18 = vsel %vm768_vm2, %v3756_v37, 0.0 }
0x138c   : > { %2670 = vadd.xlane.f32.xlu0 %v2669_v18 }
0x1415   : > { %v2671_v6 = vpop.xlane.xlu0 %2670 }
0x1416   : > { %3757 = vrcp.f32 %v2671_v6 }
0x1423   : > { %v3758_v39 = vpop.eup %3757 }
0x1424   : > { %v2673_v40 = vmul.f32 %v3758_v39, %v3756_v37 }
0x1426   : > { %3633 = vmatmul.mubr.msk.f32.vlgmr.msra.gmra.mxu1 %vm768_vm2, %v2673_v40 }
0x14e6   : > { %v2755_v41 = vpop.f32.mrf.mxu1 }
0x14e7   : > { %3644 = vmatmul.mubr.msk.f32.vlgmr.msra.gmra.mxu0 %vm694_vm1, %v2755_v41 }
0x14e8   : > { %v3634_v42 = vpop.f32.mrf.mxu1 }
0x15a7   : > { %v2832_v26 = vpop.f32.mrf.mxu0 }
0x15a8   : > { %v2836_v53 = vadd.f32 %v2832_v26, %v2580_v27 }
0x15a9   : > { %v3645_v54 = vpop.f32.mrf.mxu0 }
0x15aa   : > { %v2837_v1 = vadd.f32 %v2836_v53, %v4478_v0 }
0x15ac   : > { %v2838_v2 = vadd.f32 %v3115_v45, %v2837_v1 }
0x15ae   : > { %2839 = vadd.xlane.f32.xlu1 %v2838_v2 }
0x15b2   : > { %1723 = vadd.xlane.f32.xlu1 %v1722_v3 }
0x1637   : > { %v2840_v4 = vpop.xlane.xlu1 %2839 }
0x1638   : > { %v2841_v5 = vmul.f32 0.0078125, %v2840_v4 }
0x163a   : > { %v2842_v7 = vsub.f32 %v2838_v2, %v2841_v5 }
0x163b   : > { %v1724_v48 = vpop.xlane.xlu1 %1723 }
0x163c   : > { %v1725_v49 = vmul.f32 0.0078125, %v1724_v48  ;;  %v2843_v29 = vmul.f32 %v2842_v7, %v2842_v7 }
0x163e   : > { %v1726_v31 = vadd.f32 1e-05, %v1725_v49  ;;  %2844 = vadd.xlane.f32.xlu1 %v2843_v29 }
0x1640   : > { %3759 = vrsqrt.f32 %v1726_v31 }
0x164d   : > { %v3760_v0 = vpop.eup %3759 }
0x164e   : > { %v1728_v50 = vmul.f32 %v3760_v0, %v1721_v55 }
0x1650   : > { %v1735_v34 = vmul.f32 %v3116_v33, %v1728_v50 }
0x1652   : > { %v1742_v9 = vadd.f32 %v3117_v51, %v1735_v34 }
0x1654   : > { %1743 = vst [vmem:[%s544_s4] sm:$0xff] %v1742_v9 }
0x1655   : > { %3776 = shalt.err (!%p3773_p7)
}
0x1656   : > { %s3777_s0 = scalar_lea.hbm %s2872_s17, 128  ;;  %s3781_s23 = scalar_lea.hbm %s4765_s12, 512 }
0x1657   : > { %p3778_p9 = scmp.ne.s32.totalorder %s2872_s17, %s3777_s0  ;;  %p3782_p12 = scmp.lt.s32.totalorder %s2872_s17, %s4765_s12 }
0x1658   : > { %p3783_p13 = scmp.lt.s32.totalorder %s3781_s23, %s3777_s0 }
0x1659   : > { %p3779_p10 = pnand %p3778_p9, %p4015_p3 }
0x165a   : > { %p3784_p0 = por %p3783_p13, %p3782_p12 }
0x165b   : > { %p3780_p11 = pneg %p3779_p10 }
0x165d   : > { %p3785_p1 = pnand %p3784_p0, %p3780_p11 }
0x165f   : > { %3788 = shalt.err (!%p3785_p1)
}
0x1660   : > { %3646 = dma.vmem_to_hbm [thread:$0]  (%p4015_p3), %s2875_s20, 128, %s2872_s17, %s2854_s28  }
0x1661   : > { %s4794_s25 = sshll.u32 %s4671_s16, 3  ;;  %s4795_s0 = sshll.u32 %s4679_s18, 7 }
0x1662   : > { %s551_s1 = scalar_lea.vmem [#allocation4], %s4794_s25  ;;  %s2887_s30 = scalar_lea.hbm %s4766_s13, %s4795_s0 }
0x1663   : > { %s2889_s14 = sshll.u32 %s551_s1, 4  ;;  %s2859_s20 = scalar_lea.sflag [#allocation5], %s4671_s16  ;;  %s2890_s14 = int_to_ptr.vmem [resolvable:$true] %s2889_s14 }
0x1664   : > { %s3789_s17 = scalar_lea.vmem %s2890_s14, 128  ;;  %s3893_s28 = smov [#allocation4]  }
0x1665   : > { %p3790_p2 = scmp.ne.s32.totalorder %s2890_s14, %s3789_s17  ;;  %s3793_s4 = sshll.u32 %s3893_s28, 4  ;;  %s3794_s4 = int_to_ptr.vmem [resolvable:$false] %s3793_s4 }
0x1666   : > { %s3795_s29 = scalar_lea.vmem %s3794_s4, 256  ;;  %p3796_p6 = scmp.lt.s32.totalorder %s2890_s14, %s3794_s4 }
0x1667   : > { %p3791_p4 = pnand %p3790_p2, %p4015_p3  ;;  %p3797_p7 = scmp.lt.s32.totalorder %s3795_s29, %s3789_s17 }
0x1669   : > { %p3792_p5 = pneg %p3791_p4  ;;  %p3798_p9 = por %p3797_p7, %p3796_p6 }
0x166b   : > { %p3799_p10 = pnand %p3798_p9, %p3792_p5 }
0x16c7   : > { %v2845_v10 = vpop.xlane.xlu1 %2844 }
0x16c8   : > { %v2846_v11 = vmul.f32 0.0078125, %v2845_v10 }
0x16ca   : > { %v2847_v12 = vadd.f32 1e-05, %v2846_v11 }
0x16cc   : > { %3761 = vrsqrt.f32 %v2847_v12 }
0x16d9   : > { %v3762_v14 = vpop.eup %3761 }
0x16da   : > { %v2849_v15 = vmul.f32 %v3762_v14, %v2842_v7 }
0x16dc   : > { %v2850_v16 = vmul.f32 %v3116_v33, %v2849_v15 }
0x16de   : > { %v2851_v17 = vadd.f32 %v3117_v51, %v2850_v16 }
0x16e0   : > { %2852 = vst [vmem:[%s551_s1] sm:$0xff] %v2851_v17 }
0x16e1   : > { %3802 = shalt.err (!%p3799_p10)
}
0x16e2   : > { %s3803_s18 = scalar_lea.hbm %s2887_s30, 128  ;;  %s3807_s25 = scalar_lea.hbm %s4766_s13, 512 }
0x16e3   : > { %p3804_p11 = scmp.ne.s32.totalorder %s2887_s30, %s3803_s18  ;;  %p3808_p0 = scmp.lt.s32.totalorder %s2887_s30, %s4766_s13 }
0x16e4   : > { %p3809_p1 = scmp.lt.s32.totalorder %s3807_s25, %s3803_s18 }
0x16e5   : > { %p3805_p12 = pnand %p3804_p11, %p4015_p3 }
0x16e6   : > { %p3810_p2 = por %p3809_p1, %p3808_p0 }
0x16e7   : > { %p3806_p13 = pneg %p3805_p12 }
0x16e9   : > { %p3811_p4 = pnand %p3810_p2, %p3806_p13 }
0x16eb   : > { %3814 = shalt.err (!%p3811_p4)
}
0x16ec   : > { %3647 = dma.vmem_to_hbm [thread:$0]  (%p4015_p3), %s2890_s14, 128, %s2887_s30, %s2859_s20  }
0x16ed PF: > { %s4796_s24 = sld [smem:[#allocation8_spill]]  ;;  %p3657_p5 = scmp.ge.s32.totalorder %s3885_s15, 2 }
0x16ef   : > { %p3651_p6 = pnand %p3657_p5, %p4024_p8 }
0x16f1   : > { %p3652_p7 = pneg %p3651_p6 }
0x16f3   : > { %s2901_s19 = sand.u32 1, %s4796_s24  }
0x16f4   : > { %s2902_s17 = scalar_lea.sflag [#allocation3], %s2901_s19 }
0x16f5   : > { %3848 = dma.done.wait (%p3652_p7), %s2902_s17, 128  }
0x16f6   : > { %3850 = vsyncadd (%p3652_p7), %s2902_s17, 4294967168  ;;  %s2911_s28 = scalar_lea.sflag [#allocation5], %s2901_s19 }
0x16f7   : > { %3852 = dma.done.wait (%p3652_p7), %s2911_s28, 128  }
0x16f8   : > { %3854 = vsyncadd (%p3652_p7), %s2911_s28, 4294967168  ;;  %s30_s15 = sadd.s32 1, %s3885_s15   ;;  %s4797_s21 = sld [smem:[#allocation13_spill]] }
0x16f9   : > { %p27_p9 = scmp.ge.s32.totalorder %s30_s15, 6   ;;  %s4798_s28 = sld [smem:[#allocation9_spill]] }
0x16fa   : > { %s4799_s29 = sld [smem:[#allocation10_spill]]  ;;  %s4802_s25 = smov %s3861_s26 }
0x16fb   : > { %s4800_s30 = sld [smem:[#allocation11_spill]]  ;;  %s4803_s26 = smov %s3865_s27 }
0x16fc   : > { %s4801_s14 = sld [smem:[#allocation12_spill]]  ;;  %29 = sbr.rel (!%p27_p9) target bundleno = 11 (0xb), region = 135 }
0x16fe   : > { %s4804_s27 = smov %s4797_s21 }
0x1701   :  { %2916 = vsyncpa [#allocation3], 1 }
0x1702   :  { %2918 = vsyncpa [#allocation3 + $0x1], 1 }
0x1703   :  { %2919 = vsyncpa [#allocation5], 1 }
0x1704   :  { %2921 = vsyncpa [#allocation5 + $0x1], 1 }

</bundles_post_ra>
